<compile_context>
chip_gen: v7x
topology: tpu7x:2x2x1
jax: 0.10.0
libtpu: 0.0.40
codegen_flags: <defaults>
</compile_context>

<pallas_src>
import functools

import jax
import jax.numpy as jnp
from jax.experimental import pallas as pl
from jax.experimental.pallas import tpu as pltpu


def _attention_block_kernel(
    # flattened sequence inputs for this batch block: (block_b*L, E)
    q_ref, k_ref, v_ref,
    # multihead-attention params (weights bf16, biases f32)
    wq_ref, wk_ref, wv_ref, bq_ref, bk_ref, bv_ref, wo_ref, bo_ref,
    # first LayerNorm
    ln1_g_ref, ln1_b_ref,
    # FFN
    w1_ref, b1_ref, w2_ref, b2_ref,
    # second LayerNorm
    ln2_g_ref, ln2_b_ref,
    # outputs
    out_ref, attn_ref=None,
    *, num_heads, head_dim, block_b, eps, return_attn,
):
    f32, bf16 = jnp.float32, jnp.bfloat16
    H, hd, Bb = num_heads, head_dim, block_b

    Mq, E = q_ref.shape
    Mk = k_ref.shape[0]
    Lq, Lk = Mq // Bb, Mk // Bb

    # Read each activation slab once (f32); q_in is reused for the residual.
    q_in = q_ref[...]
    k_in = k_ref[...]
    v_in = v_ref[...]

    # ---- Q/K/V projections: M-folded 2D matmuls, bf16 operands, f32 accumulate.
    # (1/sqrt(head_dim) was pre-folded into wq/bq at init time.)
    qp = jnp.dot(q_in.astype(bf16), wq_ref[...],
                 preferred_element_type=f32) + bq_ref[...]
    kp = jnp.dot(k_in.astype(bf16), wk_ref[...],
                 preferred_element_type=f32) + bk_ref[...]
    vp = jnp.dot(v_in.astype(bf16), wv_ref[...],
                 preferred_element_type=f32) + bv_ref[...]
    kp_bf = kp.astype(bf16)

    # Block-diagonal batch mask over the folded M dims (only needed if Bb > 1).
    if Bb > 1:
        row_b = jax.lax.broadcasted_iota(jnp.int32, (Mq, Mk), 0) // Lq
        col_b = jax.lax.broadcasted_iota(jnp.int32, (Mq, Mk), 1) // Lk
        same_batch = row_b == col_b
    else:
        same_batch = None

    lane = jax.lax.broadcasted_iota(jnp.int32, (1, E), 1)
    nt = (((1,), (1,)), ((), ()))        # contract last dims of both (q @ k^T)

    ctx = jnp.zeros((Mq, E), f32)        # merged-head context, built in place
    a_sum = jnp.zeros((Mq, Mk), f32) if return_attn else None

    for h in range(H):
        # (1, E) lane mask selecting head h's feature columns: one VPU mul each
        # on q and v; the full-E contraction then only "sees" head h.  No head
        # restack, no transposes, natural (M, E) layout throughout.
        mask_h = ((lane >= h * hd) & (lane < (h + 1) * hd)).astype(f32)
        q_h = (qp * mask_h).astype(bf16)
        s = jax.lax.dot_general(q_h, kp_bf, nt,
                                preferred_element_type=f32)        # (Mq, Mk)
        if same_batch is not None:
            s = jnp.where(same_batch, s, -1e30)
        s = s - jnp.max(s, axis=-1, keepdims=True)
        e = jnp.exp(s)
        a = e * pl.reciprocal(jnp.sum(e, axis=-1, keepdims=True), approx=True)
        v_h = (vp * mask_h).astype(bf16)
        ctx = ctx + jnp.dot(a.astype(bf16), v_h, preferred_element_type=f32)
        if return_attn:
            a_sum = a_sum + a

    # ---- output projection ----
    attn_out = jnp.dot(ctx.astype(bf16), wo_ref[...],
                       preferred_element_type=f32) + bo_ref[...]

    # ---- residual + LayerNorm 1 (f32) ----
    x = q_in + attn_out
    mu = jnp.mean(x, axis=-1, keepdims=True)
    var = jnp.mean((x - mu) ** 2, axis=-1, keepdims=True)
    x = (x - mu) * jax.lax.rsqrt(var + eps) * ln1_g_ref[...] + ln1_b_ref[...]

    # ---- FFN (Linear -> ReLU -> Linear), dropout = identity (eval mode) ----
    res = x
    hid = jnp.dot(x.astype(bf16), w1_ref[...],
                  preferred_element_type=f32) + b1_ref[...]
    hid = jnp.maximum(hid, 0.0)
    y = jnp.dot(hid.astype(bf16), w2_ref[...],
                preferred_element_type=f32) + b2_ref[...]
    x = res + y

    # ---- residual + LayerNorm 2 (f32) ----
    mu2 = jnp.mean(x, axis=-1, keepdims=True)
    var2 = jnp.mean((x - mu2) ** 2, axis=-1, keepdims=True)
    x = (x - mu2) * jax.lax.rsqrt(var2 + eps) * ln2_g_ref[...] + ln2_b_ref[...]

    # Store: leading-dim-only reshape (Bb*Lq, E) -> (Bb, Lq, E) (layout-free).
    out_ref[...] = x.reshape(out_ref.shape).astype(out_ref.dtype)

    if return_attn:
        # PyTorch default average_attn_weights=True -> mean over heads, done by
        # accumulation (no reshape + leading-axis XLU mean in the epilogue).
        a_mean = a_sum * (1.0 / H)
        for b in range(Bb):
            attn_ref[b] = a_mean[b * Lq:(b + 1) * Lq,
                                 b * Lk:(b + 1) * Lk].astype(attn_ref.dtype)


def attention_block(q, k, v, params, *, num_heads, block_b=None,
                    return_attn_weights=True):
    """q, k, v: (B, L, E) float32 (batch_first).

    Returns (out (B, Lq, E), attn_weights (B, Lq, Lk)) when
    return_attn_weights=True, else just out.
    """
    B, Lq, E = q.shape
    Lk = k.shape[1]
    assert E % num_heads == 0
    head_dim = E // num_heads
    Eh = params[10].shape[1]             # FFN hidden width (for VMEM estimate)

    # Rough per-grid-step VMEM working set (f32): projections / residual / FFN
    # hidden plus the (quadratic in L) score matrices, x2 for pipeline headroom.
    def footprint(bb):
        mq, mk = bb * Lq, bb * Lk
        acts = 4 * (5 * mq * E + 2 * mk * E + mq * Eh)
        scores = 4 * 4 * mq * mk
        return 2 * (acts + scores)

    if block_b is None:
        # Prefer >= 2 grid steps (uses both v7x TensorCores and lets BlockSpec
        # double-buffer the activation slabs) unless that would drop the matmul
        # M-fill (block_b * Lq) below 128 on a non-toy problem.
        if B % 2 == 0 and ((B // 2) * Lq >= 128 or B * Lq <= 256):
            block_b = B // 2
        else:
            block_b = B
    if B % block_b != 0:
        raise ValueError("block_b must divide the batch size")

    # VMEM guard (v7x only has 64 MiB physical / 32 MiB scoped-default VMEM):
    # shrink block_b to a smaller divisor of B until the working set fits.
    VMEM_BUDGET = 24 << 20
    while block_b > 1 and footprint(block_b) > VMEM_BUDGET:
        block_b -= 1
        while B % block_b != 0:
            block_b -= 1
    nb = B // block_b

    # Flatten batch into the matmul M dimension host-side (free in XLA).
    q2 = q.reshape(B * Lq, E)
    k2 = k.reshape(B * Lk, E)
    v2 = v.reshape(B * Lk, E)

    kernel = functools.partial(
        _attention_block_kernel,
        num_heads=num_heads, head_dim=head_dim, block_b=block_b,
        eps=1e-5, return_attn=return_attn_weights,
    )

    in_specs = [
        pl.BlockSpec((block_b * Lq, E), lambda b: (b, 0)),
        pl.BlockSpec((block_b * Lk, E), lambda b: (b, 0)),
        pl.BlockSpec((block_b * Lk, E), lambda b: (b, 0)),
    ] + [pl.BlockSpec(w.shape, lambda b: (0, 0)) for w in params]  # weights resident

    out_specs = [pl.BlockSpec((block_b, Lq, E), lambda b: (b, 0, 0))]
    out_shapes = [jax.ShapeDtypeStruct((B, Lq, E), jnp.float32)]
    if return_attn_weights:
        out_specs.append(pl.BlockSpec((block_b, Lq, Lk), lambda b: (b, 0, 0)))
        out_shapes.append(jax.ShapeDtypeStruct((B, Lq, Lk), jnp.float32))

    cparams = dict(dimension_semantics=("parallel",))
    fp = footprint(block_b)
    if fp > (16 << 20):
        # Only raise the scoped-VMEM limit when the working set actually needs it.
        cparams["vmem_limit_bytes"] = min(fp + (8 << 20), 100 << 20)

    results = pl.pallas_call(
        kernel,
        out_shape=tuple(out_shapes),
        grid_spec=pltpu.PrefetchScalarGridSpec(
            num_scalar_prefetch=0,
            grid=(nb,),
            in_specs=in_specs,
            out_specs=out_specs,
        ),
        compiler_params=pltpu.CompilerParams(**cparams),
    )(q2, k2, v2, *params)

    if return_attn_weights:
        out, attn = results
        return out, attn
    (out,) = results
    return out


def init_params(key, output_dim, num_heads, mlp_ratio=4):
    """Deterministic synthetic params.

    Linear weights stored (in_features, out_features) in bfloat16 (MXU-native,
    half the DMA bytes); biases and LayerNorm params stay float32.  The
    1/sqrt(head_dim) attention scale is folded into wq (and would be folded into
    bq if it were nonzero).  NOTE: real PyTorch checkpoints store (out, in) and a
    packed in_proj_weight; they must be split/transposed + pre-scaled to load.
    """
    E = output_dim
    Hf = mlp_ratio * E
    hd = E // num_heads
    keys = jax.random.split(key, 8)
    s = 0.05
    bf16 = jnp.bfloat16
    scale = 1.0 / float(hd) ** 0.5
    wq = (jax.random.normal(keys[0], (E, E), jnp.float32) * s * scale).astype(bf16)
    wk = (jax.random.normal(keys[1], (E, E), jnp.float32) * s).astype(bf16)
    wv = (jax.random.normal(keys[2], (E, E), jnp.float32) * s).astype(bf16)
    bq = jnp.zeros((1, E), jnp.float32)   # zero, so the folded scale is a no-op
    bk = jnp.zeros((1, E), jnp.float32)
    bv = jnp.zeros((1, E), jnp.float32)
    wo = (jax.random.normal(keys[3], (E, E), jnp.float32) * s).astype(bf16)
    bo = jnp.zeros((1, E), jnp.float32)
    ln1_g = jnp.ones((1, E), jnp.float32)
    ln1_b = jnp.zeros((1, E), jnp.float32)
    w1 = (jax.random.normal(keys[4], (E, Hf), jnp.float32) * s).astype(bf16)
    b1 = jnp.zeros((1, Hf), jnp.float32)
    w2 = (jax.random.normal(keys[5], (Hf, E), jnp.float32) * s).astype(bf16)
    b2 = jnp.zeros((1, E), jnp.float32)
    ln2_g = jnp.ones((1, E), jnp.float32)
    ln2_b = jnp.zeros((1, E), jnp.float32)
    return (wq, wk, wv, bq, bk, bv, wo, bo,
            ln1_g, ln1_b, w1, b1, w2, b2, ln2_g, ln2_b)


if __name__ == "__main__":
    # Small shapes consistent with the module:
    #   batch=2, seq=8, output_dim(E)=32, num_heads=4, mlp_ratio=4 -> hidden=128
    B, Lq, Lk, E, NH = 2, 8, 8, 32, 4

    key = jax.random.PRNGKey(0)
    kq, kk, kv, kp = jax.random.split(key, 4)
    q = jax.random.normal(kq, (B, Lq, E), jnp.float32)
    k = jax.random.normal(kk, (B, Lk, E), jnp.float32)
    v = jax.random.normal(kv, (B, Lk, E), jnp.float32)
    params = init_params(kp, output_dim=E, num_heads=NH, mlp_ratio=4)

    out, attn_w = attention_block(q, k, v, params, num_heads=NH,
                                  return_attn_weights=True)
    jax.block_until_ready((out, attn_w))

    assert out.shape == (B, Lq, E)
    assert attn_w.shape == (B, Lq, Lk)
    print("KERNEL_OK")
</pallas_src>

<mosaic_0001>
module attributes {stable_mosaic.version = 11 : i64} {
  func.func @_attention_block_kernel(%arg0: i32, %arg1: memref<8x32xf32, #tpu.memory_space<vmem>>, %arg2: memref<8x32xf32, #tpu.memory_space<vmem>>, %arg3: memref<8x32xf32, #tpu.memory_space<vmem>>, %arg4: memref<32x32xbf16, #tpu.memory_space<vmem>>, %arg5: memref<32x32xbf16, #tpu.memory_space<vmem>>, %arg6: memref<32x32xbf16, #tpu.memory_space<vmem>>, %arg7: memref<1x32xf32, #tpu.memory_space<vmem>>, %arg8: memref<1x32xf32, #tpu.memory_space<vmem>>, %arg9: memref<1x32xf32, #tpu.memory_space<vmem>>, %arg10: memref<32x32xbf16, #tpu.memory_space<vmem>>, %arg11: memref<1x32xf32, #tpu.memory_space<vmem>>, %arg12: memref<1x32xf32, #tpu.memory_space<vmem>>, %arg13: memref<1x32xf32, #tpu.memory_space<vmem>>, %arg14: memref<32x128xbf16, #tpu.memory_space<vmem>>, %arg15: memref<1x128xf32, #tpu.memory_space<vmem>>, %arg16: memref<128x32xbf16, #tpu.memory_space<vmem>>, %arg17: memref<1x32xf32, #tpu.memory_space<vmem>>, %arg18: memref<1x32xf32, #tpu.memory_space<vmem>>, %arg19: memref<1x32xf32, #tpu.memory_space<vmem>>, %arg20: memref<1x8x32xf32, #tpu.memory_space<vmem>>, %arg21: memref<1x8x8xf32, #tpu.memory_space<vmem>>) attributes {dimension_semantics = [#tpu.dimension_semantics<parallel>], iteration_bounds = array<i64: 2>, scalar_prefetch = 0 : i64, scratch_operands = 0 : i64, tpu.core_type = #tpu.core_type<tc>, window_params = [{transform_indices = @transform_0, window_bounds = array<i64: 8, 32>}, {transform_indices = @transform_1, window_bounds = array<i64: 8, 32>}, {transform_indices = @transform_2, window_bounds = array<i64: 8, 32>}, {pipeline_mode = #tpu.pipeline_mode<synchronous>, transform_indices = @transform_3, window_bounds = array<i64: 32, 32>}, {pipeline_mode = #tpu.pipeline_mode<synchronous>, transform_indices = @transform_4, window_bounds = array<i64: 32, 32>}, {pipeline_mode = #tpu.pipeline_mode<synchronous>, transform_indices = @transform_5, window_bounds = array<i64: 32, 32>}, {pipeline_mode = #tpu.pipeline_mode<synchronous>, transform_indices = @transform_6, window_bounds = array<i64: 1, 32>}, {pipeline_mode = #tpu.pipeline_mode<synchronous>, transform_indices = @transform_7, window_bounds = array<i64: 1, 32>}, {pipeline_mode = #tpu.pipeline_mode<synchronous>, transform_indices = @transform_8, window_bounds = array<i64: 1, 32>}, {pipeline_mode = #tpu.pipeline_mode<synchronous>, transform_indices = @transform_9, window_bounds = array<i64: 32, 32>}, {pipeline_mode = #tpu.pipeline_mode<synchronous>, transform_indices = @transform_10, window_bounds = array<i64: 1, 32>}, {pipeline_mode = #tpu.pipeline_mode<synchronous>, transform_indices = @transform_11, window_bounds = array<i64: 1, 32>}, {pipeline_mode = #tpu.pipeline_mode<synchronous>, transform_indices = @transform_12, window_bounds = array<i64: 1, 32>}, {pipeline_mode = #tpu.pipeline_mode<synchronous>, transform_indices = @transform_13, window_bounds = array<i64: 32, 128>}, {pipeline_mode = #tpu.pipeline_mode<synchronous>, transform_indices = @transform_14, window_bounds = array<i64: 1, 128>}, {pipeline_mode = #tpu.pipeline_mode<synchronous>, transform_indices = @transform_15, window_bounds = array<i64: 128, 32>}, {pipeline_mode = #tpu.pipeline_mode<synchronous>, transform_indices = @transform_16, window_bounds = array<i64: 1, 32>}, {pipeline_mode = #tpu.pipeline_mode<synchronous>, transform_indices = @transform_17, window_bounds = array<i64: 1, 32>}, {pipeline_mode = #tpu.pipeline_mode<synchronous>, transform_indices = @transform_18, window_bounds = array<i64: 1, 32>}, {transform_indices = @transform_19, window_bounds = array<i64: 1, 8, 32>}, {transform_indices = @transform_20, window_bounds = array<i64: 1, 8, 8>}]} {
    %c0 = arith.constant 0 : index
    %c0_0 = arith.constant 0 : index
    %0 = vector.load %arg1[%c0, %c0_0] : memref<8x32xf32, #tpu.memory_space<vmem>>, vector<8x32xf32>
    %c0_1 = arith.constant 0 : index
    %c0_2 = arith.constant 0 : index
    %1 = vector.load %arg2[%c0_1, %c0_2] : memref<8x32xf32, #tpu.memory_space<vmem>>, vector<8x32xf32>
    %c0_3 = arith.constant 0 : index
    %c0_4 = arith.constant 0 : index
    %2 = vector.load %arg3[%c0_3, %c0_4] : memref<8x32xf32, #tpu.memory_space<vmem>>, vector<8x32xf32>
    %3 = arith.truncf %0 : vector<8x32xf32> to vector<8x32xbf16>
    %c0_5 = arith.constant 0 : index
    %c0_6 = arith.constant 0 : index
    %4 = vector.load %arg4[%c0_5, %c0_6] : memref<32x32xbf16, #tpu.memory_space<vmem>>, vector<32x32xbf16>
    %cst = arith.constant dense<0.000000e+00> : vector<8x32xf32>
    %5 = tpu.matmul %3, %4, %cst {dimension_numbers = #tpu.dot_dimension_numbers<[1], [0], [0], [1], [0, 0, 1, 1], [], []>} : vector<8x32xbf16>, vector<32x32xbf16>, vector<8x32xf32> -> vector<8x32xf32>
    %c0_7 = arith.constant 0 : index
    %c0_8 = arith.constant 0 : index
    %6 = vector.load %arg7[%c0_7, %c0_8] : memref<1x32xf32, #tpu.memory_space<vmem>>, vector<1x32xf32>
    %7 = vector.broadcast %6 : vector<1x32xf32> to vector<8x32xf32>
    %8 = arith.addf %5, %7 : vector<8x32xf32>
    %9 = arith.truncf %1 : vector<8x32xf32> to vector<8x32xbf16>
    %c0_9 = arith.constant 0 : index
    %c0_10 = arith.constant 0 : index
    %10 = vector.load %arg5[%c0_9, %c0_10] : memref<32x32xbf16, #tpu.memory_space<vmem>>, vector<32x32xbf16>
    %cst_11 = arith.constant dense<0.000000e+00> : vector<8x32xf32>
    %11 = tpu.matmul %9, %10, %cst_11 {dimension_numbers = #tpu.dot_dimension_numbers<[1], [0], [0], [1], [0, 0, 1, 1], [], []>} : vector<8x32xbf16>, vector<32x32xbf16>, vector<8x32xf32> -> vector<8x32xf32>
    %c0_12 = arith.constant 0 : index
    %c0_13 = arith.constant 0 : index
    %12 = vector.load %arg8[%c0_12, %c0_13] : memref<1x32xf32, #tpu.memory_space<vmem>>, vector<1x32xf32>
    %13 = vector.broadcast %12 : vector<1x32xf32> to vector<8x32xf32>
    %14 = arith.addf %11, %13 : vector<8x32xf32>
    %15 = arith.truncf %2 : vector<8x32xf32> to vector<8x32xbf16>
    %c0_14 = arith.constant 0 : index
    %c0_15 = arith.constant 0 : index
    %16 = vector.load %arg6[%c0_14, %c0_15] : memref<32x32xbf16, #tpu.memory_space<vmem>>, vector<32x32xbf16>
    %cst_16 = arith.constant dense<0.000000e+00> : vector<8x32xf32>
    %17 = tpu.matmul %15, %16, %cst_16 {dimension_numbers = #tpu.dot_dimension_numbers<[1], [0], [0], [1], [0, 0, 1, 1], [], []>} : vector<8x32xbf16>, vector<32x32xbf16>, vector<8x32xf32> -> vector<8x32xf32>
    %c0_17 = arith.constant 0 : index
    %c0_18 = arith.constant 0 : index
    %18 = vector.load %arg9[%c0_17, %c0_18] : memref<1x32xf32, #tpu.memory_space<vmem>>, vector<1x32xf32>
    %19 = vector.broadcast %18 : vector<1x32xf32> to vector<8x32xf32>
    %20 = arith.addf %17, %19 : vector<8x32xf32>
    %21 = arith.truncf %14 : vector<8x32xf32> to vector<8x32xbf16>
    %22 = tpu.iota {dimensions = array<i32: 1>} : vector<1x32xi32>
    %cst_19 = arith.constant 0.000000e+00 : f32
    %23 = vector.broadcast %cst_19 : f32 to vector<8x32xf32>
    %cst_20 = arith.constant 0.000000e+00 : f32
    %24 = vector.broadcast %cst_20 : f32 to vector<8x8xf32>
    %c0_i32 = arith.constant 0 : i32
    %25 = vector.broadcast %c0_i32 : i32 to vector<1x32xi32>
    %26 = arith.cmpi sge, %22, %25 : vector<1x32xi32>
    %c8_i32 = arith.constant 8 : i32
    %27 = vector.broadcast %c8_i32 : i32 to vector<1x32xi32>
    %28 = arith.cmpi slt, %22, %27 : vector<1x32xi32>
    %29 = arith.andi %26, %28 : vector<1x32xi1>
    %30 = arith.extui %29 : vector<1x32xi1> to vector<1x32xi32>
    %31 = arith.sitofp %30 : vector<1x32xi32> to vector<1x32xf32>
    %32 = vector.broadcast %31 : vector<1x32xf32> to vector<8x32xf32>
    %33 = arith.mulf %8, %32 : vector<8x32xf32>
    %34 = arith.truncf %33 : vector<8x32xf32> to vector<8x32xbf16>
    %cst_21 = arith.constant dense<0.000000e+00> : vector<8x8xf32>
    %35 = tpu.matmul %34, %21, %cst_21 {dimension_numbers = #tpu.dot_dimension_numbers<[1], [1], [0], [0], [0, 0, 1, 0], [], []>} : vector<8x32xbf16>, vector<8x32xbf16>, vector<8x8xf32> -> vector<8x8xf32>
    %cst_22 = arith.constant dense<0xFF800000> : vector<8xf32>
    %36 = vector.multi_reduction <maximumf>, %35, %cst_22 [1] : vector<8x8xf32> to vector<8xf32>
    %37 = vector.shape_cast %36 : vector<8xf32> to vector<8x1xf32>
    %38 = vector.broadcast %37 : vector<8x1xf32> to vector<8x8xf32>
    %39 = arith.subf %35, %38 : vector<8x8xf32>
    %40 = math.exp %39 : vector<8x8xf32>
    %cst_23 = arith.constant dense<0.000000e+00> : vector<8xf32>
    %41 = vector.multi_reduction <add>, %40, %cst_23 [1] : vector<8x8xf32> to vector<8xf32>
    %42 = vector.shape_cast %41 : vector<8xf32> to vector<8x1xf32>
    %43 = tpu.reciprocal %42 {approx = true} : vector<8x1xf32> -> vector<8x1xf32>
    %44 = vector.broadcast %43 : vector<8x1xf32> to vector<8x8xf32>
    %45 = arith.mulf %40, %44 : vector<8x8xf32>
    %46 = vector.broadcast %31 : vector<1x32xf32> to vector<8x32xf32>
    %47 = arith.mulf %20, %46 : vector<8x32xf32>
    %48 = arith.truncf %47 : vector<8x32xf32> to vector<8x32xbf16>
    %49 = arith.truncf %45 : vector<8x8xf32> to vector<8x8xbf16>
    %cst_24 = arith.constant dense<0.000000e+00> : vector<8x32xf32>
    %50 = tpu.matmul %49, %48, %cst_24 {dimension_numbers = #tpu.dot_dimension_numbers<[1], [0], [0], [1], [0, 0, 1, 1], [], []>} : vector<8x8xbf16>, vector<8x32xbf16>, vector<8x32xf32> -> vector<8x32xf32>
    %51 = arith.addf %23, %50 : vector<8x32xf32>
    %52 = arith.addf %24, %45 : vector<8x8xf32>
    %c8_i32_25 = arith.constant 8 : i32
    %53 = vector.broadcast %c8_i32_25 : i32 to vector<1x32xi32>
    %54 = arith.cmpi sge, %22, %53 : vector<1x32xi32>
    %c16_i32 = arith.constant 16 : i32
    %55 = vector.broadcast %c16_i32 : i32 to vector<1x32xi32>
    %56 = arith.cmpi slt, %22, %55 : vector<1x32xi32>
    %57 = arith.andi %54, %56 : vector<1x32xi1>
    %58 = arith.extui %57 : vector<1x32xi1> to vector<1x32xi32>
    %59 = arith.sitofp %58 : vector<1x32xi32> to vector<1x32xf32>
    %60 = vector.broadcast %59 : vector<1x32xf32> to vector<8x32xf32>
    %61 = arith.mulf %8, %60 : vector<8x32xf32>
    %62 = arith.truncf %61 : vector<8x32xf32> to vector<8x32xbf16>
    %cst_26 = arith.constant dense<0.000000e+00> : vector<8x8xf32>
    %63 = tpu.matmul %62, %21, %cst_26 {dimension_numbers = #tpu.dot_dimension_numbers<[1], [1], [0], [0], [0, 0, 1, 0], [], []>} : vector<8x32xbf16>, vector<8x32xbf16>, vector<8x8xf32> -> vector<8x8xf32>
    %cst_27 = arith.constant dense<0xFF800000> : vector<8xf32>
    %64 = vector.multi_reduction <maximumf>, %63, %cst_27 [1] : vector<8x8xf32> to vector<8xf32>
    %65 = vector.shape_cast %64 : vector<8xf32> to vector<8x1xf32>
    %66 = vector.broadcast %65 : vector<8x1xf32> to vector<8x8xf32>
    %67 = arith.subf %63, %66 : vector<8x8xf32>
    %68 = math.exp %67 : vector<8x8xf32>
    %cst_28 = arith.constant dense<0.000000e+00> : vector<8xf32>
    %69 = vector.multi_reduction <add>, %68, %cst_28 [1] : vector<8x8xf32> to vector<8xf32>
    %70 = vector.shape_cast %69 : vector<8xf32> to vector<8x1xf32>
    %71 = tpu.reciprocal %70 {approx = true} : vector<8x1xf32> -> vector<8x1xf32>
    %72 = vector.broadcast %71 : vector<8x1xf32> to vector<8x8xf32>
    %73 = arith.mulf %68, %72 : vector<8x8xf32>
    %74 = vector.broadcast %59 : vector<1x32xf32> to vector<8x32xf32>
    %75 = arith.mulf %20, %74 : vector<8x32xf32>
    %76 = arith.truncf %75 : vector<8x32xf32> to vector<8x32xbf16>
    %77 = arith.truncf %73 : vector<8x8xf32> to vector<8x8xbf16>
    %cst_29 = arith.constant dense<0.000000e+00> : vector<8x32xf32>
    %78 = tpu.matmul %77, %76, %cst_29 {dimension_numbers = #tpu.dot_dimension_numbers<[1], [0], [0], [1], [0, 0, 1, 1], [], []>} : vector<8x8xbf16>, vector<8x32xbf16>, vector<8x32xf32> -> vector<8x32xf32>
    %79 = arith.addf %51, %78 : vector<8x32xf32>
    %80 = arith.addf %52, %73 : vector<8x8xf32>
    %c16_i32_30 = arith.constant 16 : i32
    %81 = vector.broadcast %c16_i32_30 : i32 to vector<1x32xi32>
    %82 = arith.cmpi sge, %22, %81 : vector<1x32xi32>
    %c24_i32 = arith.constant 24 : i32
    %83 = vector.broadcast %c24_i32 : i32 to vector<1x32xi32>
    %84 = arith.cmpi slt, %22, %83 : vector<1x32xi32>
    %85 = arith.andi %82, %84 : vector<1x32xi1>
    %86 = arith.extui %85 : vector<1x32xi1> to vector<1x32xi32>
    %87 = arith.sitofp %86 : vector<1x32xi32> to vector<1x32xf32>
    %88 = vector.broadcast %87 : vector<1x32xf32> to vector<8x32xf32>
    %89 = arith.mulf %8, %88 : vector<8x32xf32>
    %90 = arith.truncf %89 : vector<8x32xf32> to vector<8x32xbf16>
    %cst_31 = arith.constant dense<0.000000e+00> : vector<8x8xf32>
    %91 = tpu.matmul %90, %21, %cst_31 {dimension_numbers = #tpu.dot_dimension_numbers<[1], [1], [0], [0], [0, 0, 1, 0], [], []>} : vector<8x32xbf16>, vector<8x32xbf16>, vector<8x8xf32> -> vector<8x8xf32>
    %cst_32 = arith.constant dense<0xFF800000> : vector<8xf32>
    %92 = vector.multi_reduction <maximumf>, %91, %cst_32 [1] : vector<8x8xf32> to vector<8xf32>
    %93 = vector.shape_cast %92 : vector<8xf32> to vector<8x1xf32>
    %94 = vector.broadcast %93 : vector<8x1xf32> to vector<8x8xf32>
    %95 = arith.subf %91, %94 : vector<8x8xf32>
    %96 = math.exp %95 : vector<8x8xf32>
    %cst_33 = arith.constant dense<0.000000e+00> : vector<8xf32>
    %97 = vector.multi_reduction <add>, %96, %cst_33 [1] : vector<8x8xf32> to vector<8xf32>
    %98 = vector.shape_cast %97 : vector<8xf32> to vector<8x1xf32>
    %99 = tpu.reciprocal %98 {approx = true} : vector<8x1xf32> -> vector<8x1xf32>
    %100 = vector.broadcast %99 : vector<8x1xf32> to vector<8x8xf32>
    %101 = arith.mulf %96, %100 : vector<8x8xf32>
    %102 = vector.broadcast %87 : vector<1x32xf32> to vector<8x32xf32>
    %103 = arith.mulf %20, %102 : vector<8x32xf32>
    %104 = arith.truncf %103 : vector<8x32xf32> to vector<8x32xbf16>
    %105 = arith.truncf %101 : vector<8x8xf32> to vector<8x8xbf16>
    %cst_34 = arith.constant dense<0.000000e+00> : vector<8x32xf32>
    %106 = tpu.matmul %105, %104, %cst_34 {dimension_numbers = #tpu.dot_dimension_numbers<[1], [0], [0], [1], [0, 0, 1, 1], [], []>} : vector<8x8xbf16>, vector<8x32xbf16>, vector<8x32xf32> -> vector<8x32xf32>
    %107 = arith.addf %79, %106 : vector<8x32xf32>
    %108 = arith.addf %80, %101 : vector<8x8xf32>
    %c24_i32_35 = arith.constant 24 : i32
    %109 = vector.broadcast %c24_i32_35 : i32 to vector<1x32xi32>
    %110 = arith.cmpi sge, %22, %109 : vector<1x32xi32>
    %c32_i32 = arith.constant 32 : i32
    %111 = vector.broadcast %c32_i32 : i32 to vector<1x32xi32>
    %112 = arith.cmpi slt, %22, %111 : vector<1x32xi32>
    %113 = arith.andi %110, %112 : vector<1x32xi1>
    %114 = arith.extui %113 : vector<1x32xi1> to vector<1x32xi32>
    %115 = arith.sitofp %114 : vector<1x32xi32> to vector<1x32xf32>
    %116 = vector.broadcast %115 : vector<1x32xf32> to vector<8x32xf32>
    %117 = arith.mulf %8, %116 : vector<8x32xf32>
    %118 = arith.truncf %117 : vector<8x32xf32> to vector<8x32xbf16>
    %cst_36 = arith.constant dense<0.000000e+00> : vector<8x8xf32>
    %119 = tpu.matmul %118, %21, %cst_36 {dimension_numbers = #tpu.dot_dimension_numbers<[1], [1], [0], [0], [0, 0, 1, 0], [], []>} : vector<8x32xbf16>, vector<8x32xbf16>, vector<8x8xf32> -> vector<8x8xf32>
    %cst_37 = arith.constant dense<0xFF800000> : vector<8xf32>
    %120 = vector.multi_reduction <maximumf>, %119, %cst_37 [1] : vector<8x8xf32> to vector<8xf32>
    %121 = vector.shape_cast %120 : vector<8xf32> to vector<8x1xf32>
    %122 = vector.broadcast %121 : vector<8x1xf32> to vector<8x8xf32>
    %123 = arith.subf %119, %122 : vector<8x8xf32>
    %124 = math.exp %123 : vector<8x8xf32>
    %cst_38 = arith.constant dense<0.000000e+00> : vector<8xf32>
    %125 = vector.multi_reduction <add>, %124, %cst_38 [1] : vector<8x8xf32> to vector<8xf32>
    %126 = vector.shape_cast %125 : vector<8xf32> to vector<8x1xf32>
    %127 = tpu.reciprocal %126 {approx = true} : vector<8x1xf32> -> vector<8x1xf32>
    %128 = vector.broadcast %127 : vector<8x1xf32> to vector<8x8xf32>
    %129 = arith.mulf %124, %128 : vector<8x8xf32>
    %130 = vector.broadcast %115 : vector<1x32xf32> to vector<8x32xf32>
    %131 = arith.mulf %20, %130 : vector<8x32xf32>
    %132 = arith.truncf %131 : vector<8x32xf32> to vector<8x32xbf16>
    %133 = arith.truncf %129 : vector<8x8xf32> to vector<8x8xbf16>
    %cst_39 = arith.constant dense<0.000000e+00> : vector<8x32xf32>
    %134 = tpu.matmul %133, %132, %cst_39 {dimension_numbers = #tpu.dot_dimension_numbers<[1], [0], [0], [1], [0, 0, 1, 1], [], []>} : vector<8x8xbf16>, vector<8x32xbf16>, vector<8x32xf32> -> vector<8x32xf32>
    %135 = arith.addf %107, %134 : vector<8x32xf32>
    %136 = arith.addf %108, %129 : vector<8x8xf32>
    %137 = arith.truncf %135 : vector<8x32xf32> to vector<8x32xbf16>
    %c0_40 = arith.constant 0 : index
    %c0_41 = arith.constant 0 : index
    %138 = vector.load %arg10[%c0_40, %c0_41] : memref<32x32xbf16, #tpu.memory_space<vmem>>, vector<32x32xbf16>
    %cst_42 = arith.constant dense<0.000000e+00> : vector<8x32xf32>
    %139 = tpu.matmul %137, %138, %cst_42 {dimension_numbers = #tpu.dot_dimension_numbers<[1], [0], [0], [1], [0, 0, 1, 1], [], []>} : vector<8x32xbf16>, vector<32x32xbf16>, vector<8x32xf32> -> vector<8x32xf32>
    %c0_43 = arith.constant 0 : index
    %c0_44 = arith.constant 0 : index
    %140 = vector.load %arg11[%c0_43, %c0_44] : memref<1x32xf32, #tpu.memory_space<vmem>>, vector<1x32xf32>
    %141 = vector.broadcast %140 : vector<1x32xf32> to vector<8x32xf32>
    %142 = arith.addf %139, %141 : vector<8x32xf32>
    %143 = arith.addf %0, %142 : vector<8x32xf32>
    %cst_45 = arith.constant dense<0.000000e+00> : vector<8xf32>
    %144 = vector.multi_reduction <add>, %143, %cst_45 [1] : vector<8x32xf32> to vector<8xf32>
    %145 = vector.shape_cast %144 : vector<8xf32> to vector<8x1xf32>
    %cst_46 = arith.constant 3.200000e+01 : f32
    %146 = vector.broadcast %cst_46 : f32 to vector<8x1xf32>
    %147 = arith.divf %145, %146 : vector<8x1xf32>
    %148 = vector.broadcast %147 : vector<8x1xf32> to vector<8x32xf32>
    %149 = arith.subf %143, %148 : vector<8x32xf32>
    %150 = arith.mulf %149, %149 : vector<8x32xf32>
    %cst_47 = arith.constant dense<0.000000e+00> : vector<8xf32>
    %151 = vector.multi_reduction <add>, %150, %cst_47 [1] : vector<8x32xf32> to vector<8xf32>
    %152 = vector.shape_cast %151 : vector<8xf32> to vector<8x1xf32>
    %cst_48 = arith.constant 3.200000e+01 : f32
    %153 = vector.broadcast %cst_48 : f32 to vector<8x1xf32>
    %154 = arith.divf %152, %153 : vector<8x1xf32>
    %155 = vector.broadcast %147 : vector<8x1xf32> to vector<8x32xf32>
    %156 = arith.subf %143, %155 : vector<8x32xf32>
    %cst_49 = arith.constant 9.99999974E-6 : f32
    %157 = vector.broadcast %cst_49 : f32 to vector<8x1xf32>
    %158 = arith.addf %154, %157 : vector<8x1xf32>
    %159 = math.rsqrt %158 : vector<8x1xf32>
    %160 = vector.broadcast %159 : vector<8x1xf32> to vector<8x32xf32>
    %161 = arith.mulf %156, %160 : vector<8x32xf32>
    %c0_50 = arith.constant 0 : index
    %c0_51 = arith.constant 0 : index
    %162 = vector.load %arg12[%c0_50, %c0_51] : memref<1x32xf32, #tpu.memory_space<vmem>>, vector<1x32xf32>
    %163 = vector.broadcast %162 : vector<1x32xf32> to vector<8x32xf32>
    %164 = arith.mulf %161, %163 : vector<8x32xf32>
    %c0_52 = arith.constant 0 : index
    %c0_53 = arith.constant 0 : index
    %165 = vector.load %arg13[%c0_52, %c0_53] : memref<1x32xf32, #tpu.memory_space<vmem>>, vector<1x32xf32>
    %166 = vector.broadcast %165 : vector<1x32xf32> to vector<8x32xf32>
    %167 = arith.addf %164, %166 : vector<8x32xf32>
    %168 = arith.truncf %167 : vector<8x32xf32> to vector<8x32xbf16>
    %c0_54 = arith.constant 0 : index
    %c0_55 = arith.constant 0 : index
    %169 = vector.load %arg14[%c0_54, %c0_55] : memref<32x128xbf16, #tpu.memory_space<vmem>>, vector<32x128xbf16>
    %cst_56 = arith.constant dense<0.000000e+00> : vector<8x128xf32>
    %170 = tpu.matmul %168, %169, %cst_56 {dimension_numbers = #tpu.dot_dimension_numbers<[1], [0], [0], [1], [0, 0, 1, 1], [], []>} : vector<8x32xbf16>, vector<32x128xbf16>, vector<8x128xf32> -> vector<8x128xf32>
    %c0_57 = arith.constant 0 : index
    %c0_58 = arith.constant 0 : index
    %171 = vector.load %arg15[%c0_57, %c0_58] : memref<1x128xf32, #tpu.memory_space<vmem>>, vector<1x128xf32>
    %172 = vector.broadcast %171 : vector<1x128xf32> to vector<8x128xf32>
    %173 = arith.addf %170, %172 : vector<8x128xf32>
    %cst_59 = arith.constant 0.000000e+00 : f32
    %174 = vector.broadcast %cst_59 : f32 to vector<8x128xf32>
    %175 = arith.maximumf %173, %174 : vector<8x128xf32>
    %176 = arith.truncf %175 : vector<8x128xf32> to vector<8x128xbf16>
    %c0_60 = arith.constant 0 : index
    %c0_61 = arith.constant 0 : index
    %177 = vector.load %arg16[%c0_60, %c0_61] : memref<128x32xbf16, #tpu.memory_space<vmem>>, vector<128x32xbf16>
    %cst_62 = arith.constant dense<0.000000e+00> : vector<8x32xf32>
    %178 = tpu.matmul %176, %177, %cst_62 {dimension_numbers = #tpu.dot_dimension_numbers<[1], [0], [0], [1], [0, 0, 1, 1], [], []>} : vector<8x128xbf16>, vector<128x32xbf16>, vector<8x32xf32> -> vector<8x32xf32>
    %c0_63 = arith.constant 0 : index
    %c0_64 = arith.constant 0 : index
    %179 = vector.load %arg17[%c0_63, %c0_64] : memref<1x32xf32, #tpu.memory_space<vmem>>, vector<1x32xf32>
    %180 = vector.broadcast %179 : vector<1x32xf32> to vector<8x32xf32>
    %181 = arith.addf %178, %180 : vector<8x32xf32>
    %182 = arith.addf %167, %181 : vector<8x32xf32>
    %cst_65 = arith.constant dense<0.000000e+00> : vector<8xf32>
    %183 = vector.multi_reduction <add>, %182, %cst_65 [1] : vector<8x32xf32> to vector<8xf32>
    %184 = vector.shape_cast %183 : vector<8xf32> to vector<8x1xf32>
    %cst_66 = arith.constant 3.200000e+01 : f32
    %185 = vector.broadcast %cst_66 : f32 to vector<8x1xf32>
    %186 = arith.divf %184, %185 : vector<8x1xf32>
    %187 = vector.broadcast %186 : vector<8x1xf32> to vector<8x32xf32>
    %188 = arith.subf %182, %187 : vector<8x32xf32>
    %189 = arith.mulf %188, %188 : vector<8x32xf32>
    %cst_67 = arith.constant dense<0.000000e+00> : vector<8xf32>
    %190 = vector.multi_reduction <add>, %189, %cst_67 [1] : vector<8x32xf32> to vector<8xf32>
    %191 = vector.shape_cast %190 : vector<8xf32> to vector<8x1xf32>
    %cst_68 = arith.constant 3.200000e+01 : f32
    %192 = vector.broadcast %cst_68 : f32 to vector<8x1xf32>
    %193 = arith.divf %191, %192 : vector<8x1xf32>
    %194 = vector.broadcast %186 : vector<8x1xf32> to vector<8x32xf32>
    %195 = arith.subf %182, %194 : vector<8x32xf32>
    %cst_69 = arith.constant 9.99999974E-6 : f32
    %196 = vector.broadcast %cst_69 : f32 to vector<8x1xf32>
    %197 = arith.addf %193, %196 : vector<8x1xf32>
    %198 = math.rsqrt %197 : vector<8x1xf32>
    %199 = vector.broadcast %198 : vector<8x1xf32> to vector<8x32xf32>
    %200 = arith.mulf %195, %199 : vector<8x32xf32>
    %c0_70 = arith.constant 0 : index
    %c0_71 = arith.constant 0 : index
    %201 = vector.load %arg18[%c0_70, %c0_71] : memref<1x32xf32, #tpu.memory_space<vmem>>, vector<1x32xf32>
    %202 = vector.broadcast %201 : vector<1x32xf32> to vector<8x32xf32>
    %203 = arith.mulf %200, %202 : vector<8x32xf32>
    %c0_72 = arith.constant 0 : index
    %c0_73 = arith.constant 0 : index
    %204 = vector.load %arg19[%c0_72, %c0_73] : memref<1x32xf32, #tpu.memory_space<vmem>>, vector<1x32xf32>
    %205 = vector.broadcast %204 : vector<1x32xf32> to vector<8x32xf32>
    %206 = arith.addf %203, %205 : vector<8x32xf32>
    %207 = vector.shape_cast %206 : vector<8x32xf32> to vector<1x8x32xf32>
    %c0_74 = arith.constant 0 : index
    %c0_75 = arith.constant 0 : index
    %c0_76 = arith.constant 0 : index
    %208 = vector.load %arg20[%c0_74, %c0_75, %c0_76] : memref<1x8x32xf32, #tpu.memory_space<vmem>>, vector<1x8x32xf32>
    tpu.vector_store %arg20[%c0_74, %c0_75, %c0_76], %207 {strides = array<i32>} : memref<1x8x32xf32, #tpu.memory_space<vmem>>, vector<1x8x32xf32>,
    %cst_77 = arith.constant 2.500000e-01 : f32
    %209 = vector.broadcast %cst_77 : f32 to vector<8x8xf32>
    %210 = arith.mulf %136, %209 : vector<8x8xf32>
    %c0_78 = arith.constant 0 : index
    %c0_79 = arith.constant 0 : index
    %c0_80 = arith.constant 0 : index
    %211 = vector.load %arg21[%c0_78, %c0_79, %c0_80] : memref<1x8x8xf32, #tpu.memory_space<vmem>>, vector<1x8x8xf32>
    %212 = vector.shape_cast %211 : vector<1x8x8xf32> to vector<8x8xf32>
    %213 = vector.shape_cast %210 : vector<8x8xf32> to vector<1x8x8xf32>
    tpu.vector_store %arg21[%c0_78, %c0_79, %c0_80], %213 {strides = array<i32>} : memref<1x8x8xf32, #tpu.memory_space<vmem>>, vector<1x8x8xf32>,
    return
  }
  func.func @transform_0(%arg0: i32) -> (i32, i32) {
    %c0_i32 = arith.constant 0 : i32
    %c0_i32_0 = arith.constant 0 : i32
    return %arg0, %c0_i32 : i32, i32
  }
  func.func @transform_1(%arg0: i32) -> (i32, i32) {
    %c0_i32 = arith.constant 0 : i32
    %c0_i32_0 = arith.constant 0 : i32
    return %arg0, %c0_i32 : i32, i32
  }
  func.func @transform_2(%arg0: i32) -> (i32, i32) {
    %c0_i32 = arith.constant 0 : i32
    %c0_i32_0 = arith.constant 0 : i32
    return %arg0, %c0_i32 : i32, i32
  }
  func.func @transform_3(%arg0: i32) -> (i32, i32) {
    %c0_i32 = arith.constant 0 : i32
    %c0_i32_0 = arith.constant 0 : i32
    %c0_i32_1 = arith.constant 0 : i32
    return %c0_i32, %c0_i32_0 : i32, i32
  }
  func.func @transform_4(%arg0: i32) -> (i32, i32) {
    %c0_i32 = arith.constant 0 : i32
    %c0_i32_0 = arith.constant 0 : i32
    %c0_i32_1 = arith.constant 0 : i32
    return %c0_i32, %c0_i32_0 : i32, i32
  }
  func.func @transform_5(%arg0: i32) -> (i32, i32) {
    %c0_i32 = arith.constant 0 : i32
    %c0_i32_0 = arith.constant 0 : i32
    %c0_i32_1 = arith.constant 0 : i32
    return %c0_i32, %c0_i32_0 : i32, i32
  }
  func.func @transform_6(%arg0: i32) -> (i32, i32) {
    %c0_i32 = arith.constant 0 : i32
    %c0_i32_0 = arith.constant 0 : i32
    %c0_i32_1 = arith.constant 0 : i32
    return %c0_i32, %c0_i32_0 : i32, i32
  }
  func.func @transform_7(%arg0: i32) -> (i32, i32) {
    %c0_i32 = arith.constant 0 : i32
    %c0_i32_0 = arith.constant 0 : i32
    %c0_i32_1 = arith.constant 0 : i32
    return %c0_i32, %c0_i32_0 : i32, i32
  }
  func.func @transform_8(%arg0: i32) -> (i32, i32) {
    %c0_i32 = arith.constant 0 : i32
    %c0_i32_0 = arith.constant 0 : i32
    %c0_i32_1 = arith.constant 0 : i32
    return %c0_i32, %c0_i32_0 : i32, i32
  }
  func.func @transform_9(%arg0: i32) -> (i32, i32) {
    %c0_i32 = arith.constant 0 : i32
    %c0_i32_0 = arith.constant 0 : i32
    %c0_i32_1 = arith.constant 0 : i32
    return %c0_i32, %c0_i32_0 : i32, i32
  }
  func.func @transform_10(%arg0: i32) -> (i32, i32) {
    %c0_i32 = arith.constant 0 : i32
    %c0_i32_0 = arith.constant 0 : i32
    %c0_i32_1 = arith.constant 0 : i32
    return %c0_i32, %c0_i32_0 : i32, i32
  }
  func.func @transform_11(%arg0: i32) -> (i32, i32) {
    %c0_i32 = arith.constant 0 : i32
    %c0_i32_0 = arith.constant 0 : i32
    %c0_i32_1 = arith.constant 0 : i32
    return %c0_i32, %c0_i32_0 : i32, i32
  }
  func.func @transform_12(%arg0: i32) -> (i32, i32) {
    %c0_i32 = arith.constant 0 : i32
    %c0_i32_0 = arith.constant 0 : i32
    %c0_i32_1 = arith.constant 0 : i32
    return %c0_i32, %c0_i32_0 : i32, i32
  }
  func.func @transform_13(%arg0: i32) -> (i32, i32) {
    %c0_i32 = arith.constant 0 : i32
    %c0_i32_0 = arith.constant 0 : i32
    %c0_i32_1 = arith.constant 0 : i32
    return %c0_i32, %c0_i32_0 : i32, i32
  }
  func.func @transform_14(%arg0: i32) -> (i32, i32) {
    %c0_i32 = arith.constant 0 : i32
    %c0_i32_0 = arith.constant 0 : i32
    %c0_i32_1 = arith.constant 0 : i32
    return %c0_i32, %c0_i32_0 : i32, i32
  }
  func.func @transform_15(%arg0: i32) -> (i32, i32) {
    %c0_i32 = arith.constant 0 : i32
    %c0_i32_0 = arith.constant 0 : i32
    %c0_i32_1 = arith.constant 0 : i32
    return %c0_i32, %c0_i32_0 : i32, i32
  }
  func.func @transform_16(%arg0: i32) -> (i32, i32) {
    %c0_i32 = arith.constant 0 : i32
    %c0_i32_0 = arith.constant 0 : i32
    %c0_i32_1 = arith.constant 0 : i32
    return %c0_i32, %c0_i32_0 : i32, i32
  }
  func.func @transform_17(%arg0: i32) -> (i32, i32) {
    %c0_i32 = arith.constant 0 : i32
    %c0_i32_0 = arith.constant 0 : i32
    %c0_i32_1 = arith.constant 0 : i32
    return %c0_i32, %c0_i32_0 : i32, i32
  }
  func.func @transform_18(%arg0: i32) -> (i32, i32) {
    %c0_i32 = arith.constant 0 : i32
    %c0_i32_0 = arith.constant 0 : i32
    %c0_i32_1 = arith.constant 0 : i32
    return %c0_i32, %c0_i32_0 : i32, i32
  }
  func.func @transform_19(%arg0: i32) -> (i32, i32, i32) {
    %c0_i32 = arith.constant 0 : i32
    %c0_i32_0 = arith.constant 0 : i32
    %c0_i32_1 = arith.constant 0 : i32
    return %arg0, %c0_i32, %c0_i32_0 : i32, i32, i32
  }
  func.func @transform_20(%arg0: i32) -> (i32, i32, i32) {
    %c0_i32 = arith.constant 0 : i32
    %c0_i32_0 = arith.constant 0 : i32
    %c0_i32_1 = arith.constant 0 : i32
    return %arg0, %c0_i32, %c0_i32_0 : i32, i32, i32
  }
}

</mosaic_0001>

<bundles_post_ra>
// kernel: tpu_custom_call.1
= control target key start
LH: loop header
LB: loop body
LE: loop exit
PB: predicated region body
PF: predicated region fallthrough
CT: control target
= control target key end

     0   :  { %s3175_s0 = inlined_call_operand.vmem [shape: f32[16,32], index: 0, kind: input, shape index: {}]   ;;  %s3176_s1 = inlined_call_operand.vmem [shape: f32[16,32], index: 1, kind: input, shape index: {}]   ;;  %s3177_s2 = inlined_call_operand.vmem [shape: f32[16,32], index: 2, kind: input, shape index: {}]   ;;  %s3178_s3 = inlined_call_operand.vmem [shape: bf16[32,32], index: 3, kind: input, shape index: {}]   ;;  %s3179_s4 = inlined_call_operand.vmem [shape: bf16[32,32], index: 4, kind: input, shape index: {}]   ;;  %s3180_s5 = inlined_call_operand.hbm [shape: bf16[32,32], index: 5, kind: input, shape index: {}]   ;;  %s3181_s6 = inlined_call_operand.vmem [shape: f32[1,32], index: 6, kind: input, shape index: {}]   ;;  %s3182_s7 = inlined_call_operand.hbm [shape: f32[1,32], index: 7, kind: input, shape index: {}]   ;;  %s3183_s8 = inlined_call_operand.hbm [shape: f32[1,32], index: 8, kind: input, shape index: {}]   ;;  %s3184_s9 = inlined_call_operand.vmem [shape: bf16[32,32], index: 9, kind: input, shape index: {}]   ;;  %s3185_s10 = inlined_call_operand.hbm [shape: f32[1,32], index: 10, kind: input, shape index: {}]   ;;  %s3186_s11 = inlined_call_operand.hbm [shape: f32[1,32], index: 11, kind: input, shape index: {}]   ;;  %s3187_s12 = inlined_call_operand.hbm [shape: f32[1,32], index: 12, kind: input, shape index: {}]   ;;  %s3188_s13 = inlined_call_operand.vmem [shape: bf16[32,128], index: 13, kind: input, shape index: {}]   ;;  %s3189_s14 = inlined_call_operand.vmem [shape: f32[1,128], index: 14, kind: input, shape index: {}]   ;;  %s3190_s15 = inlined_call_operand.vmem [shape: bf16[128,32], index: 15, kind: input, shape index: {}]   ;;  %s3191_s16 = inlined_call_operand.vmem [shape: f32[1,32], index: 16, kind: input, shape index: {}]   ;;  %s3192_s17 = inlined_call_operand.vmem [shape: f32[1,32], index: 17, kind: input, shape index: {}]   ;;  %s3193_s18 = inlined_call_operand.vmem [shape: f32[1,32], index: 18, kind: input, shape index: {}]   ;;  %s3194_s19 = inlined_call_operand.hbm [shape: f32[2,8,32], index: 19, kind: output, shape index: {0}]   ;;  %s3195_s20 = inlined_call_operand.hbm [shape: f32[2,8,8], index: 20, kind: output, shape index: {1}]  }
   0x1   :  { %3211 = sst [smem:[#allocation29_spill]] %s3175_s0 }
   0x2   :  { %3212 = sst [smem:[#allocation30_spill]] %s3176_s1 }
   0x3   :  { %3213 = sst [smem:[#allocation31_spill]] %s3177_s2 }
   0x4   :  { %3214 = sst [smem:[#allocation32_spill]] %s3178_s3 }
   0x5   :  { %3215 = sst [smem:[#allocation33_spill]] %s3179_s4 }
   0x6   :  { %3216 = sst [smem:[#allocation34_spill]] %s3182_s7 }
   0x7   :  { %3217 = sst [smem:[#allocation35_spill]] %s3185_s10 }
   0x8   :  { %3218 = sst [smem:[#allocation36_spill]] %s3192_s17 }
   0x9   :  { %3219 = sst [smem:[#allocation37_spill]] %s3193_s18 }
   0xa   :  { %3220 = sst [smem:[#allocation38_spill]] %s3194_s19 }
   0xb   :  { %3221 = sst [smem:[#allocation39_spill]] %s3195_s20 }
   0xc   :  { %26 = vsyncpa [#allocation3], 0 }
   0xd   :  { %27 = vsyncpa [#allocation6], 0 }
   0xe   :  { %28 = vsyncpa [#allocation9], 0 }
   0xf   :  { %29 = vsyncpa [#allocation12], 0 }
  0x10   :  { %30 = vsyncpa [#allocation4], 0 }
  0x11   :  { %32 = vsyncpa [#allocation4 + $0x1], 0 }
  0x12   :  { %33 = vsyncpa [#allocation15], 0 }
  0x13   :  { %35 = vsyncpa [#allocation15 + $0x1], 0  ;;  %s2702_s1 = smov 0   ;;  %s2704_s22 = smov 0  }
  0x14   :  { %s2706_s23 = smov 0   ;;  %s2708_s24 = smov 0  }
  0x15 LB: > { %3222 = sst [smem:[#allocation22_spill]] %s2571_s1  ;;  %s2723_s2 = sadd.s32 4294967295, %s2583_s24   ;;  %s2583_s24 = sphi %s2708_s24, %s3261_s24   ;;  %s2579_s23 = sphi %s2706_s23, %s3263_s23   ;;  %s2575_s22 = sphi %s2704_s22, %s3265_s22   ;;  %s2571_s1 = sphi %s2702_s1, %s3264_s1  }
  0x16   : > { %3223 = sst [smem:[#allocation23_spill]] %s2579_s23  ;;  %s1926_s25 = sadd.s32 4294967294, %s2583_s24  }
  0x17   : > { %3224 = sst [smem:[#allocation24_spill]] %s2583_s24  ;;  %s2727_s3 = sadd.s32 1, %s2583_s24  }
  0x18   : > { %3225 = sst [smem:[#allocation25_spill]] %s2727_s3  ;;  %s462_s26 = sadd.s32 1, %s2579_s23 }
  0x19   : > { %s459_s27 = ssub.s32 %s2583_s24, %s2727_s3  ;;  %p472_p0 = scmp.ne.s32.totalorder %s2579_s23, %s2575_s22 }
  0x1a   : > { %p460_p1 = scmp.eq.s32.totalorder %s459_s27, 0  ;;  %p473_p2 = scmp.eq.s32.totalorder %s2723_s2, 1 }
  0x1b   : > { %p478_p3 = scmp.ne.s32.totalorder %s2575_s22, %s2571_s1  ;;  %p479_p4 = scmp.eq.s32.totalorder %s1926_s25, 1 }
  0x1c   : > { %s2738_s28 = scalar_select %p460_p1, %s2579_s23, %s462_s26  }
  0x1d   : > { %p2740_p5 = por %p473_p2, %p472_p0  ;;  %p2744_p6 = por %p479_p4, %p478_p3 }
  0x1e   : > { %3226 = sst [smem:[#allocation26_spill]] %s2738_s28  ;;  %p1927_p7 = scmp.ge.s32.totalorder %s2583_s24, 1 }
  0x1f   : > { %s3227_s4 = scalar_select %p2740_p5, 1, 0 }
  0x20   : > { %s3229_s29 = scalar_select %p2744_p6, 1, 0 }
  0x21   : > { %3228 = sst [smem:[#allocation27_spill]] %s3227_s4  ;;  %p512_p8 = scmp.lt.s32.totalorder %s2583_s24, 3 }
  0x22   : > { %3230 = sst [smem:[#allocation28_spill]] %s3229_s29  ;;  %p3205_p9 = scmp.eq.s32.totalorder %s2723_s2, 0 }
  0x23   : > { %p2751_p10 = pnand %p1927_p7, %p512_p8  ;;  %s2585_s0 = smov [#allocation5]  }
  0x24   : > { %s547_s21 = sshll.u32 %s2585_s0, 4  ;;  %s2586_s25 = smov [#allocation8]   ;;  %s548_s21 = int_to_ptr.vmem [resolvable:$true] %s547_s21 }
  0x25   : > { %s3231_s30 = scalar_select %p2751_p10, 1, 0 }
  0x26   : > { %p2186_p11 = pneg %p2751_p10  ;;  %s572_s26 = sshll.u32 %s2586_s25, 4  ;;  %s2763_s26 = int_to_ptr.vmem [resolvable:$true] %s572_s26 }
  0x27   : > { %s2587_s28 = smov [#allocation2]   ;;  %s3233_s7 = sld [smem:[#allocation34_spill]] }
  0x28   : > { %p2759_p12 = pnand %p3205_p9, %p2186_p11  ;;  %s530_s23 = sshll.u32 %s2587_s28, 4  ;;  %s2765_s23 = int_to_ptr.vmem [resolvable:$true] %s530_s23 }
  0x2a   : > { %p2775_p0 = pneg %p2759_p12 }
  0x2d   : > { %s2305_s0 = scalar_lea.hbm %s3233_s7, 16 }
  0x2e   : > { %p2306_p13 = scmp.ne.s32.totalorder %s3233_s7, %s2305_s0  ;;  %p2312_p3 = scmp.lt.u32.totalorder %s2305_s0, %s3233_s7 }
  0x30   : > { %p2308_p1 = pnand %p2775_p0, %p2306_p13 }
  0x32   : > { %p2309_p2 = pneg %p2308_p1 }
  0x34   : > { %p2314_p4 = pnand %p2312_p3, %p2309_p2 }
  0x36   : > { %2317 = shalt.err (!%p2314_p4)
}
  0x37   : > { %s2318_s3 = scalar_lea.vmem %s548_s21, 16  ;;  %s2325_s1 = scalar_lea.vmem %s548_s21, 32 }
  0x38   : > { %p2319_p7 = scmp.ne.s32.totalorder %s548_s21, %s2318_s3  ;;  %p2326_p9 = scmp.lt.s32.totalorder %s548_s21, %s548_s21 }
  0x39   : > { %p2327_p6 = scmp.lt.s32.totalorder %s2325_s1, %s2318_s3 }
  0x3a   : > { %p2321_p8 = pnand %p2319_p7, %p2775_p0 }
  0x3b   : > { %p2328_p5 = por %p2327_p6, %p2326_p9 }
  0x3c   : > { %p2322_p11 = pneg %p2321_p8 }
  0x3e   : > { %p2329_p10 = pnand %p2328_p5, %p2322_p11 }
  0x40   : > { %2332 = shalt.err (!%p2329_p10)
}
  0x41   : > { %2192 = dma.hbm_to_vmem [thread:$0]  (!%p2759_p12), %s3233_s7, 16, %s548_s21, [#allocation6]  }
  0x42   : > { %s3235_s10 = sld [smem:[#allocation35_spill]] }
  0x48   : > { %s2333_s28 = scalar_lea.hbm %s3235_s10, 16 }
  0x49   : > { %p2334_p13 = scmp.ne.s32.totalorder %s3235_s10, %s2333_s28  ;;  %p2340_p5 = scmp.lt.u32.totalorder %s2333_s28, %s3235_s10 }
  0x4b   : > { %p2336_p1 = pnand %p2334_p13, %p2775_p0 }
  0x4d   : > { %p2337_p6 = pneg %p2336_p1 }
  0x4f   : > { %p2342_p9 = pnand %p2340_p5, %p2337_p6 }
  0x51   : > { %2345 = shalt.err (!%p2342_p9)
}
  0x52   : > { %s2346_s21 = scalar_lea.vmem %s2763_s26, 16  ;;  %s2353_s17 = scalar_lea.vmem %s2763_s26, 32 }
  0x53   : > { %p2347_p10 = scmp.ne.s32.totalorder %s2763_s26, %s2346_s21  ;;  %p2354_p4 = scmp.lt.s32.totalorder %s2763_s26, %s2763_s26 }
  0x54   : > { %p2355_p7 = scmp.lt.s32.totalorder %s2353_s17, %s2346_s21 }
  0x55   : > { %p2349_p2 = pnand %p2347_p10, %p2775_p0 }
  0x56   : > { %p2356_p8 = por %p2355_p7, %p2354_p4 }
  0x57   : > { %p2350_p3 = pneg %p2349_p2 }
  0x59   : > { %p2357_p11 = pnand %p2356_p8, %p2350_p3 }
  0x5b   : > { %2360 = shalt.err (!%p2357_p11)
}
  0x5c   : > { %2198 = dma.hbm_to_vmem [thread:$0]  (!%p2759_p12), %s3235_s10, 16, %s2763_s26, [#allocation9]  }
  0x5d   : > { %s2361_s0 = scalar_lea.hbm %s3180_s5, 256 }
  0x5e   : > { %p2362_p13 = scmp.ne.s32.totalorder %s3180_s5, %s2361_s0  ;;  %p2368_p5 = scmp.lt.u32.totalorder %s2361_s0, %s3180_s5 }
  0x60   : > { %p2364_p1 = pnand %p2362_p13, %p2775_p0 }
  0x62   : > { %p2365_p6 = pneg %p2364_p1 }
  0x64   : > { %p2370_p9 = pnand %p2368_p5, %p2365_p6 }
  0x66   : > { %2373 = shalt.err (!%p2370_p9)
}
  0x67   : > { %s2374_s26 = scalar_lea.vmem %s2765_s23, 256  ;;  %p2382_p4 = scmp.lt.s32.totalorder %s2765_s23, %s2765_s23 }
  0x68   : > { %p2375_p10 = scmp.ne.s32.totalorder %s2765_s23, %s2374_s26  ;;  %p2383_p7 = scmp.lt.s32.totalorder %s2374_s26, %s2374_s26 }
  0x6a   : > { %p2377_p2 = pnand %p2375_p10, %p2775_p0  ;;  %p2384_p8 = por %p2383_p7, %p2382_p4 }
  0x6c   : > { %p2378_p3 = pneg %p2377_p2 }
  0x6e   : > { %p2385_p11 = pnand %p2384_p8, %p2378_p3 }
  0x70   : > { %2388 = shalt.err (!%p2385_p11)
}
  0x71   : > { %s2588_s17 = smov 64   ;;  %s2589_s18 = smov 4  }
  0x72   : > { %2189 = dma.hbm_to_vmem [thread:$0]  (!%p2759_p12), %s3180_s5, 256, %s2765_s23, [#allocation3], %s2588_s17, %s2588_s17, %s2589_s18  }
  0x73   : > { %s2590_s19 = smov [#allocation7]   ;;  %s2591_s28 = smov [#allocation10]  }
  0x74   : > { %s558_s0 = sshll.u32 %s2590_s19, 4  ;;  %s583_s3 = sshll.u32 %s2591_s28, 4  ;;  %s559_s0 = int_to_ptr.vmem [resolvable:$true] %s558_s0  ;;  %s584_s3 = int_to_ptr.vmem [resolvable:$true] %s583_s3 }
  0x75   : > { %s2389_s26 = scalar_lea.hbm %s3183_s8, 16 }
  0x76   : > { %p2390_p13 = scmp.ne.s32.totalorder %s3183_s8, %s2389_s26  ;;  %p2396_p5 = scmp.lt.u32.totalorder %s2389_s26, %s3183_s8 }
  0x78   : > { %p2392_p1 = pnand %p2390_p13, %p2775_p0 }
  0x7a   : > { %p2393_p6 = pneg %p2392_p1 }
  0x7c   : > { %p2398_p9 = pnand %p2396_p5, %p2393_p6 }
  0x7e   : > { %2401 = shalt.err (!%p2398_p9)
}
  0x7f   : > { %s2402_s23 = scalar_lea.vmem %s559_s0, 16  ;;  %s2409_s17 = scalar_lea.vmem %s559_s0, 32 }
  0x80   : > { %p2403_p10 = scmp.ne.s32.totalorder %s559_s0, %s2402_s23  ;;  %p2410_p4 = scmp.lt.s32.totalorder %s559_s0, %s559_s0 }
  0x81   : > { %p2411_p7 = scmp.lt.s32.totalorder %s2409_s17, %s2402_s23 }
  0x82   : > { %p2405_p2 = pnand %p2403_p10, %p2775_p0 }
  0x83   : > { %p2412_p8 = por %p2411_p7, %p2410_p4 }
  0x84   : > { %p2406_p3 = pneg %p2405_p2 }
  0x86   : > { %p2413_p11 = pnand %p2412_p8, %p2406_p3 }
  0x88   : > { %2416 = shalt.err (!%p2413_p11)
}
  0x89   : > { %2195 = dma.hbm_to_vmem [thread:$0]  (!%p2759_p12), %s3183_s8, 16, %s559_s0, [#allocation6]  }
  0x8a   : > { %s2417_s18 = scalar_lea.hbm %s3186_s11, 16 }
  0x8b   : > { %p2418_p13 = scmp.ne.s32.totalorder %s3186_s11, %s2417_s18  ;;  %p2424_p5 = scmp.lt.u32.totalorder %s2417_s18, %s3186_s11 }
  0x8d   : > { %p2420_p1 = pnand %p2418_p13, %p2775_p0 }
  0x8f   : > { %p2421_p6 = pneg %p2420_p1 }
  0x91   : > { %p2426_p9 = pnand %p2424_p5, %p2421_p6 }
  0x93   : > { %2429 = shalt.err (!%p2426_p9)
}
  0x94   : > { %s2430_s1 = scalar_lea.vmem %s584_s3, 16  ;;  %s2437_s0 = scalar_lea.vmem %s584_s3, 32 }
  0x95   : > { %p2431_p10 = scmp.ne.s32.totalorder %s584_s3, %s2430_s1  ;;  %p2438_p4 = scmp.lt.s32.totalorder %s584_s3, %s584_s3 }
  0x96   : > { %p2439_p7 = scmp.lt.s32.totalorder %s2437_s0, %s2430_s1 }
  0x97   : > { %p2433_p2 = pnand %p2431_p10, %p2775_p0 }
  0x98   : > { %p2440_p8 = por %p2439_p7, %p2438_p4 }
  0x99   : > { %p2434_p3 = pneg %p2433_p2 }
  0x9b   : > { %p2441_p11 = pnand %p2440_p8, %p2434_p3 }
  0x9d   : > { %2444 = shalt.err (!%p2441_p11)
}
  0x9e   : > { %2201 = dma.hbm_to_vmem [thread:$0]  (!%p2759_p12), %s3186_s11, 16, %s584_s3, [#allocation9]  }
  0x9f   : > { %s2592_s23 = smov [#allocation11]   ;;  %s2445_s20 = scalar_lea.hbm %s3187_s12, 16 }
  0xa0   : > { %s594_s17 = sshll.u32 %s2592_s23, 4  ;;  %p2446_p13 = scmp.ne.s32.totalorder %s3187_s12, %s2445_s20  ;;  %s595_s17 = int_to_ptr.vmem [resolvable:$true] %s594_s17 }
  0xa1   : > { %p2452_p5 = scmp.lt.u32.totalorder %s2445_s20, %s3187_s12 }
  0xa2   : > { %p2448_p1 = pnand %p2446_p13, %p2775_p0 }
  0xa4   : > { %p2449_p6 = pneg %p2448_p1 }
  0xa6   : > { %p2454_p9 = pnand %p2452_p5, %p2449_p6 }
  0xa8   : > { %2457 = shalt.err (!%p2454_p9)
}
  0xa9   : > { %s2458_s3 = scalar_lea.vmem %s595_s17, 16  ;;  %s2465_s19 = scalar_lea.vmem %s595_s17, 32 }
  0xaa   : > { %p2459_p10 = scmp.ne.s32.totalorder %s595_s17, %s2458_s3  ;;  %p2466_p4 = scmp.lt.s32.totalorder %s595_s17, %s595_s17 }
  0xab   : > { %p2467_p7 = scmp.lt.s32.totalorder %s2465_s19, %s2458_s3 }
  0xac   : > { %p2461_p2 = pnand %p2459_p10, %p2775_p0 }
  0xad   : > { %p2468_p8 = por %p2467_p7, %p2466_p4 }
  0xae   : > { %p2462_p3 = pneg %p2461_p2 }
  0xb0   : > { %p2469_p11 = pnand %p2468_p8, %p2462_p3 }
  0xb2   : > { %2472 = shalt.err (!%p2469_p11)
}
  0xb3   : > { %2204 = dma.hbm_to_vmem [thread:$0]  (!%p2759_p12), %s3187_s12, 16, %s595_s17, [#allocation12]  }
  0xb4   : > { %p3236_p13 = scmp.ne.s32.totalorder %s3231_s30, 0 }
  0xb5   : > { %p3237_p1 = scmp.eq.s32.totalorder (!%p3236_p13), %s2723_s2, 0 }
  0xb6   : > { %646 = sbr.rel (%p3236_p13) target bundleno = 2517 (0x9d5), region = 96 }
  0xbd   : > { %2546 = dma.done.wait (%p3237_p1), [#allocation3], 256   ;;  %p3238_p0 = pmov %p3237_p1 }
  0xbf   : > { %2548 = vsyncadd (%p3238_p0), [#allocation3], 4294967040  ;;  %p3239_p6 = pmov %p3238_p0 }
  0xc0   : > { %p3240_p5 = pmov %p3238_p0 }
  0xc1   : > { %2550 = dma.done.wait (%p3239_p6), [#allocation6], 32  }
  0xc2   : > { %2552 = vsyncadd (%p3240_p5), [#allocation6], 4294967264  ;;  %p3241_p9 = pmov %p3238_p0 }
  0xc3   : > { %p3242_p12 = pmov %p3238_p0 }
  0xc4   : > { %2554 = dma.done.wait (%p3241_p9), [#allocation9], 32  }
  0xc5   : > { %2556 = vsyncadd (%p3242_p12), [#allocation9], 4294967264  ;;  %p3243_p10 = pmov %p3238_p0 }
  0xc6   : > { %p3244_p2 = pmov %p3238_p0 }
  0xc7   : > { %2558 = dma.done.wait (%p3243_p10), [#allocation12], 16  }
  0xc8   : > { %2560 = vsyncadd (%p3244_p2), [#allocation12], 4294967280  ;;  %p736_p3 = scmp.lt.s32.totalorder %s2723_s2, 1  ;;  %v2593_v0 = vmov 0.0   ;;  %vm2594_vm0 = vmmov 0   ;;  %s3245_s21 = sld [smem:[#allocation29_spill]]  ;;  %v955_v13 = vlaneseq }
  0xc9   : > { %2038 = vmatprep.subr.bf16.mxu0 %v2593_v0  ;;  %2042 = vmatprep.mubr.msk.bf16.mxu0 %vm2594_vm0, %v2593_v0  ;;  %s3246_s7 = sld [smem:[#allocation32_spill]]  ;;  %vm776_vm1 = vcmask 261120   ;;  %s3247_s24 = sld [smem:[#allocation33_spill]]  ;;  %v2271_v9 = vld [vmem:[#allocation2] sm:$0xff]   ;;  %v2272_v10 = vld [vmem:[#allocation2 + $0x8] sm:$0xff]   ;;  %vm1093_vm12 = vcmask 1043456  }
  0xca   : > { %s737_s30 = scalar_select %p736_p3, %s2723_s2, 1  ;;  %2062 = vmatprep.subr.bf16.mxu1 %v2593_v0  ;;  %2064 = vmatprep.mubr.msk.bf16.mxu1 %vm2594_vm0, %v2593_v0  ;;  %v956_v16 = vand.u32 127, %v955_v13  ;;  %v1951_v19 = vld [vmem:[#allocation5] ss:$0 sm:$0xff]  ;;  %v1947_v20 = vld [vmem:[%s3181_s6] ss:$0 sm:$0xff] }
  0xcb   : > { %s3249_s28 = sld [smem:[#allocation30_spill]]  ;;  %v1955_v41 = vld [vmem:[#allocation7] ss:$0 sm:$0xff]  ;;  %vm1010_vm13 = vcmask 64512   ;;  %s3012_s4 = sand.u32 1, %s2575_s22  }
  0xcc   : > { %s2918_s27 = sshll.u32 %s737_s30, 3  ;;  %vm1026_vm2 = vcmp.ge.s32.totalorder %v956_v16, 8  ;;  %vm1027_vm3 = vcmp.lt.s32.totalorder %v956_v16, 16  ;;  %vm958_vm5 = vcmp.lt.s32.totalorder %v956_v16, 8  ;;  %vm1184_vm6 = vcmp.ge.s32.totalorder %v956_v16, 16  ;;  %s1942_s18 = sshll.u32 %s3012_s4, 3 }
  0xcd   : > { %vm1028_vm4 = vmand %vm1026_vm2, %vm1027_vm3  ;;  %v1959_v29 = vsel %vm958_vm5, 1.0, %v2593_v0  ;;  %vm1185_vm7 = vcmp.lt.s32.totalorder %v956_v16, 24  ;;  %vm1296_vm9 = vcmp.ge.s32.totalorder %v956_v16, 24  ;;  %vm1297_vm10 = vcmp.lt.s32.totalorder %v956_v16, 32  ;;  %s3251_s10 = sld [smem:[#allocation27_spill]]  ;;  %s1994_s20 = sshll.u32 %s2723_s2, 7 }
  0xce   : > { %s739_s26 = scalar_lea.vmem %s3245_s21, %s2918_s27  ;;  %v1961_v28 = vsel %vm1028_vm4, 1.0, %v2593_v0  ;;  %vm1186_vm8 = vmand %vm1184_vm6, %vm1185_vm7  ;;  %s1725_s25 = scalar_lea.sflag [#allocation15], %s3012_s4 }
  0xcf   : > { %v2267_v1 = vld [vmem:[%s3246_s7] sm:$0xff]   ;;  %v2268_v2 = vld [vmem:[%s3246_s7 + $0x8] sm:$0xff]   ;;  %s3248_s29 = smov %s3247_s24  ;;  %v1965_v35 = vsel %vm1186_vm8, 1.0, %v2593_v0  ;;  %vm1298_vm11 = vmand %vm1296_vm9, %vm1297_vm10  ;;  %s2595_s21 = smov [#allocation14]  }
  0xd0   : > { %2039 = vmatpush3.bf16.msra.mxu0 %v2267_v1  ;;  %v2930_v3 = vld [vmem:[%s739_s26] sm:$0xff]  ;;  %v2270_v6 = vld [vmem:[%s3248_s29 + $0x8] sm:$0xff]   ;;  %s3250_s26 = sld [smem:[#allocation31_spill]]  ;;  %v1968_v38 = vsel %vm1298_vm11, 1.0, %v2593_v0 }
  0xd1   : > { %2040 = vmatprep.subr.bf16.mxu0 %v2593_v0  ;;  %v2269_v4 = vld [vmem:[%s3247_s24] sm:$0xff]   ;;  %v752_v5 = vpack.c.bf16 %v2930_v3, %v2930_v3  ;;  %s743_s1 = scalar_lea.vmem %s3249_s28, %s2918_s27  ;;  %s3022_s24 = scalar_lea.vmem [#allocation14], %s1942_s18 }
  0xd2   : > { %v750_v7 = vld [vmem:[%s743_s1] sm:$0xff]  ;;  %s3252_s28 = sld [smem:[#allocation39_spill]]  ;;  %s1751_s30 = sshll.u32 %s3022_s24, 4  ;;  %s1752_s30 = int_to_ptr.vmem [resolvable:$true] %s1751_s30 }
  0xd3   : > { %v820_v8 = vpack.c.bf16 %v750_v7, %v750_v7  ;;  %s2473_s0 = scalar_lea.vmem %s1752_s30, 128  ;;  %p3253_p7 = scmp.ne.s32.totalorder %s3251_s10, 0 }
  0xd4   : > { %2041 = vmatpush3.bf16.msra.mxu0 %v2268_v2  ;;  %p2474_p4 = scmp.ne.s32.totalorder %s1752_s30, %s2473_s0 }
  0xd5   : > { %2046 = vmatprep.subr.bf16.mxu0 %v2593_v0 }
  0xd6   : > { %s747_s23 = scalar_lea.vmem %s3250_s26, %s2918_s27  ;;  %p2475_p8 = pnand %p2474_p4, %p3253_p7 }
  0xd7   : > { %2043 = vmatmul.mubr.msk.bf16.vlgmr.msra.gmra.mrb[0].mxu0 %vm776_vm1, %v752_v5  ;;  %v751_v11 = vld [vmem:[%s747_s23] sm:$0xff]  ;;  %s2477_s26 = sshll.u32 %s2595_s21, 4  ;;  %s2478_s26 = int_to_ptr.vmem [resolvable:$false] %s2477_s26 }
  0xd8   : > { %2047 = vmatpush3.bf16.msra.mxu0 %v2269_v4  ;;  %2050 = vmatprep.mubr.msk.bf16.mxu0 %vm2594_vm0, %v2593_v0  ;;  %v887_v12 = vpack.c.bf16 %v751_v11, %v751_v11  ;;  %s3097_s1 = scalar_lea.hbm %s3252_s28, %s1994_s20  ;;  %p2476_p11 = pneg %p2475_p8 }
  0xd9   : > { %2048 = vmatprep.subr.bf16.mxu0 %v2593_v0  ;;  %s2479_s23 = scalar_lea.vmem %s2478_s26, 256  ;;  %p2480_p13 = scmp.lt.s32.totalorder %s1752_s30, %s2478_s26 }
  0xda   : > { %p2481_p1 = scmp.lt.s32.totalorder %s2479_s23, %s2473_s0 }
  0xdc   : > { %2049 = vmatpush3.bf16.msra.mxu0 %v2270_v6  ;;  %p2482_p0 = por %p2481_p1, %p2480_p13 }
  0xdd   : > { %2054 = vmatprep.subr.bf16.mxu0 %v2593_v0 }
  0xde   : > { %p2483_p6 = pnand %p2482_p0, %p2476_p11 }
  0xdf   : > { %2051 = vmatmul.mubr.msk.bf16.vlgmr.msra.gmra.mrb[4].mxu0 %vm776_vm1, %v820_v8 }
  0xe0   : > { %2058 = vmatprep.mubr.msk.bf16.mxu0 %vm2594_vm0, %v2593_v0  ;;  %2055 = vmatpush3.bf16.msra.mxu0 %v2271_v9 }
  0xe1   : > { %2056 = vmatprep.subr.bf16.mxu0 %v2593_v0 }
  0xe4   : > { %2057 = vmatpush3.bf16.msra.mxu0 %v2272_v10 }
  0xe5   : > { %2068 = vmatprep.subr.bf16.mxu0 %v2593_v0 }
  0xe7   : > { %2059 = vmatmul.mubr.msk.bf16.vlgmr.msra.gmra.mrb[8].mxu0 %vm776_vm1, %v887_v12 }
  0xe8   : > { %2070 = vmatprep.mubr.msk.bf16.mxu0 %vm2594_vm0, %v2593_v0 }
 0x1aa   : > { %v814_v14 = vpop.f32.mrb[0].mxu0 }
 0x1ab   : > { %v2044_v15 = vpop.f32.mrb[1].mxu0  ;;  %v815_v25 = vadd.f32 %v1947_v20, %v814_v14 }
 0x1ac   : > { %v817_v17 = vpop.f32.mrb[2].mxu0 }
 0x1ad   : > { %v2045_v18 = vpop.f32.mrb[3].mxu0  ;;  %v1031_v31 = vmul.f32 %v1961_v28, %v815_v25  ;;  %v962_v32 = vmul.f32 %v1959_v29, %v815_v25  ;;  %v1189_v36 = vmul.f32 %v1965_v35, %v815_v25  ;;  %v1301_v39 = vmul.f32 %v1968_v38, %v815_v25 }
 0x1af   : > { %v1032_v33 = vpack.c.bf16 %v1031_v31, %v1031_v31  ;;  %v963_v34 = vpack.c.bf16 %v962_v32, %v962_v32  ;;  %v1190_v37 = vpack.c.bf16 %v1189_v36, %v1189_v36  ;;  %v1302_v40 = vpack.c.bf16 %v1301_v39, %v1301_v39 }
 0x1b2   : > { %v881_v21 = vpop.f32.mrb[4].mxu0 }
 0x1b3   : > { %v882_v22 = vadd.f32 %v1951_v19, %v881_v21  ;;  %v2052_v23 = vpop.f32.mrb[5].mxu0 }
 0x1b4   : > { %v884_v24 = vpop.f32.mrb[6].mxu0 }
 0x1b5   : > { %v954_v26 = vpack.c.bf16 %v882_v22, %v882_v22  ;;  %v2053_v27 = vpop.f32.mrb[7].mxu0 }
 0x1b7   : > { %v968_v30 = vsel %vm776_vm1, %v954_v26, 0 }
 0x1b8   : > { %2063 = vmatpush3.bf16.xpose.msra.mxu1 %v968_v30  ;;  %2069 = vmatpush3.bf16.xpose.msra.mxu0 %v968_v30 }
 0x1b9   : > { %2086 = vmatprep.subr.bf16.mxu0 %v2593_v0  ;;  %2074 = vmatprep.subr.bf16.mxu1 %v2593_v0 }
 0x1ba   : > { %v948_v42 = vpop.f32.mrb[8].mxu0 }
 0x1bb   : > { %v2060_v43 = vpop.f32.mrb[9].mxu0  ;;  %v949_v44 = vadd.f32 %v1955_v41, %v948_v42 }
 0x1bc   : > { %v951_v45 = vpop.f32.mrb[10].mxu0 }
 0x1bd   : > { %v2061_v46 = vpop.f32.mrb[11].mxu0  ;;  %v1087_v47 = vmul.f32 %v1961_v28, %v949_v44  ;;  %v1022_v48 = vmul.f32 %v1959_v29, %v949_v44  ;;  %v1245_v49 = vmul.f32 %v1965_v35, %v949_v44  ;;  %v1357_v50 = vmul.f32 %v1968_v38, %v949_v44 }
 0x1bf   : > { %2065 = vmatmul.mubr.msk.bf16.vlgmr.msra.gmra.mrb[0].mxu1 %vm776_vm1, %v963_v34  ;;  %2071 = vmatmul.mubr.msk.bf16.vlgmr.msra.gmra.mrb[12].mxu0 %vm776_vm1, %v1032_v33  ;;  %v1088_v51 = vpack.c.bf16 %v1087_v47, %v1087_v47  ;;  %v1023_v52 = vpack.c.bf16 %v1022_v48, %v1022_v48  ;;  %v1246_v53 = vpack.c.bf16 %v1245_v49, %v1245_v49 }
 0x1c0   : > { %2087 = vmatpush3.bf16.xpose.msra.mxu0 %v968_v30  ;;  %2088 = vmatprep.mubr.msk.bf16.mxu0 %vm2594_vm0, %v2593_v0  ;;  %v1358_v54 = vpack.c.bf16 %v1357_v50, %v1357_v50 }
 0x1c1   : > { %2098 = vmatprep.subr.bf16.mxu0 %v2593_v0  ;;  %2076 = vmatprep.mubr.msk.bf16.mxu1 %vm2594_vm0, %v2593_v0  ;;  %v1095_v55 = vsel %vm1093_vm12, %v1088_v51, 0  ;;  %v2987_v56 = vsel %vm1093_vm12, %v1023_v52, 0  ;;  %v2989_v57 = vsel %vm1093_vm12, %v1246_v53, 0 }
 0x1c2   : > { %2075 = vmatpush3.bf16.msra.mxu1 %v1095_v55  ;;  %v2991_v58 = vsel %vm1093_vm12, %v1358_v54, 0 }
 0x1c3   : > { %2080 = vmatprep.subr.bf16.mxu1 %v2593_v0 }
 0x1c7   : > { %2089 = vmatmul.mubr.msk.bf16.vlgmr.msra.gmra.mrb[16].mxu0 %vm776_vm1, %v1190_v37  ;;  %v2273_v37 = vld [vmem:[%s3184_s9] sm:$0xff]  }
 0x1c8   : > { %2099 = vmatpush3.bf16.xpose.msra.mxu0 %v968_v30  ;;  %2100 = vmatprep.mubr.msk.bf16.mxu0 %vm2594_vm0, %v2593_v0 }
 0x1c9   : > { %2110 = vmatprep.subr.bf16.mxu0 %v2593_v0 }
 0x1cf   : > { %2101 = vmatmul.mubr.msk.bf16.vlgmr.msra.gmra.mrb[20].mxu0 %vm776_vm1, %v1302_v40 }
 0x1d0   : > { %2114 = vmatprep.mubr.msk.bf16.mxu0 %vm2594_vm0, %v2593_v0  ;;  %2111 = vmatpush3.bf16.msra.mxu0 %v2273_v37 }
 0x1d1   : > { %2112 = vmatprep.subr.bf16.mxu0 %v2593_v0 }
 0x292   : > { %v1004_v59 = vpop.f32.mrb[0].mxu1  ;;  %v1070_v60 = vpop.f32.mrb[12].mxu0 }
 0x293   : > { %v2066_v61 = vpop.f32.mrb[1].mxu1  ;;  %v2072_v62 = vpop.f32.mrb[13].mxu0  ;;  %v1076_v63 = vsel %vm1010_vm13, %v1070_v60, -inf  ;;  %v1011_v6 = vsel %vm1010_vm13, %v1004_v59, -inf }
 0x294   : > { %v1007_v1 = vpop.f32.mrb[2].mxu1  ;;  %1077 = vmax.xlane.f32.xlu0 %v1076_v63  ;;  %v1073_v2 = vpop.f32.mrb[14].mxu0 }
 0x295   : > { %v2067_v4 = vpop.f32.mrb[3].mxu1  ;;  %v2073_v5 = vpop.f32.mrb[15].mxu0  ;;  %v1971_v1 = vld [vmem:[#allocation8] ss:$0 sm:$0xff] }
 0x298   : > { %1012 = vmax.xlane.f32.xlu0 %v1011_v6 }
 0x29a   : > { %v1228_v7 = vpop.f32.mrb[16].mxu0 }
 0x29b   : > { %v2090_v8 = vpop.f32.mrb[17].mxu0  ;;  %v1234_v9 = vsel %vm1010_vm13, %v1228_v7, -inf }
 0x29c   : > { %1235 = vmax.xlane.f32.xlu1 %v1234_v9  ;;  %v1231_v10 = vpop.f32.mrb[18].mxu0 }
 0x29d   : > { %v2091_v11 = vpop.f32.mrb[19].mxu0 }
 0x2a2   : > { %v1340_v12 = vpop.f32.mrb[20].mxu0 }
 0x2a3   : > { %v2102_v13 = vpop.f32.mrb[21].mxu0  ;;  %v1346_v14 = vsel %vm1010_vm13, %v1340_v12, -inf }
 0x2a4   : > { %1347 = vmax.xlane.f32.xlu1 %v1346_v14  ;;  %v1343_v15 = vpop.f32.mrb[22].mxu0 }
 0x2a5   : > { %v2103_v16 = vpop.f32.mrb[23].mxu0  ;;  %v2275_v15 = vld [vmem:[%s3188_s13] sm:$0xff]  }
 0x2a6   : > { %v2276_v16 = vld [vmem:[%s3188_s13 + $0x8] sm:$0xff]  }
 0x321   : > { %v1078_v17 = vpop.xlane.xlu0 %1077 }
 0x322   : > { %v1079_v18 = vsub.f32 %v1070_v60, %v1078_v17  ;;  %v2278_v17 = vld [vmem:[%s3190_s15 + $0x8] sm:$0xff]  }
 0x324   : > { %v1080_v19 = vmul.f32 1.442695, %v1079_v18  ;;  %v2279_v18 = vld [vmem:[%s3190_s15 + $0x10] sm:$0xff]  }
 0x325   : > { %v1013_v20 = vpop.xlane.xlu0 %1012 }
 0x326   : > { %2285 = vpow2.f32 %v1080_v19  ;;  %v1014_v21 = vsub.f32 %v1004_v59, %v1013_v20  ;;  %v2274_v59 = vld [vmem:[%s3184_s9 + $0x8] sm:$0xff]   ;;  %v2280_v19 = vld [vmem:[%s3190_s15 + $0x18] sm:$0xff]   ;;  %v2281_v20 = vld [vmem:[%s3190_s15 + $0x20] sm:$0xff]  }
 0x327   : > { %2113 = vmatpush3.bf16.msra.mxu0 %v2274_v59 }
 0x328   : > { %v1015_v22 = vmul.f32 1.442695, %v1014_v21  ;;  %2118 = vmatprep.subr.bf16.mxu0 %v2593_v0  ;;  %v2282_v21 = vld [vmem:[%s3190_s15 + $0x28] sm:$0xff]  }
 0x329   : > { %v1236_v23 = vpop.xlane.xlu1 %1235 }
 0x32a   : > { %2287 = vpow2.f32 %v1015_v22  ;;  %v1237_v24 = vsub.f32 %v1228_v7, %v1236_v23 }
 0x32c   : > { %v1238_v25 = vmul.f32 1.442695, %v1237_v24 }
 0x32e   : > { %2289 = vpow2.f32 %v1238_v25 }
 0x330   : > { %v2286_v26 = vpop.eup %2285 }
 0x331   : > { %v1348_v27 = vpop.xlane.xlu1 %1347  ;;  %v1082_v28 = vsel %vm1010_vm13, %v2286_v26, 0.0 }
 0x332   : > { %v1349_v29 = vsub.f32 %v1340_v12, %v1348_v27  ;;  %1083 = vadd.xlane.f32.xlu0 %v1082_v28  ;;  %v1976_v28 = vld [vmem:[#allocation11] ss:$0 sm:$0xff] }
 0x334   : > { %v2288_v30 = vpop.eup %2287  ;;  %v1350_v31 = vmul.f32 1.442695, %v1349_v29 }
 0x335   : > { %v1017_v32 = vsel %vm1010_vm13, %v2288_v30, 0.0 }
 0x336   : > { %2291 = vpow2.f32 %v1350_v31  ;;  %1018 = vadd.xlane.f32.xlu1 %v1017_v32  ;;  %v2283_v32 = vld [vmem:[%s3190_s15 + $0x30] sm:$0xff]  }
 0x338   : > { %v2290_v33 = vpop.eup %2289 }
 0x339   : > { %v1240_v34 = vsel %vm1010_vm13, %v2290_v33, 0.0 }
 0x33a   : > { %1241 = vadd.xlane.f32.xlu0 %v1240_v34  ;;  %v1977_v34 = vld [vmem:[%s3189_s14] ss:$0 sm:$0xff] }
 0x340   : > { %v2292_v35 = vpop.eup %2291 }
 0x341   : > { %v1352_v36 = vsel %vm1010_vm13, %v2292_v35, 0.0 }
 0x342   : > { %1353 = vadd.xlane.f32.xlu1 %v1352_v36 }
 0x3bf   : > { %v1084_v38 = vpop.xlane.xlu0 %1083 }
 0x3c0   : > { %2293 = vrcp.f32 %v1084_v38 }
 0x3c3   : > { %v1019_v39 = vpop.xlane.xlu1 %1018 }
 0x3c4   : > { %2295 = vrcp.f32 %v1019_v39 }
 0x3c7   : > { %v1242_v40 = vpop.xlane.xlu0 %1241 }
 0x3c8   : > { %2297 = vrcp.f32 %v1242_v40 }
 0x3ca   : > { %v2294_v41 = vpop.eup %2293 }
 0x3cb   : > { %v1086_v42 = vmul.f32 %v2294_v41, %v2286_v26  ;;  %v1975_v26 = vld [vmem:[#allocation10] ss:$0 sm:$0xff] }
 0x3cd   : > { %v1089_v43 = vpack.c.bf16 %v1086_v42, %v1086_v42 }
 0x3ce   : > { %v2296_v45 = vpop.eup %2295 }
 0x3cf   : > { %2077 = vmatmul.mubr.msk.bf16.vlgmr.msra.gmra.mrb[4].mxu1 %vm1010_vm13, %v1089_v43  ;;  %v1354_v44 = vpop.xlane.xlu1 %1353  ;;  %v1021_v47 = vmul.f32 %v2296_v45, %v2288_v30 }
 0x3d0   : > { %2081 = vmatpush3.bf16.msra.mxu1 %v2987_v56  ;;  %2299 = vrcp.f32 %v1354_v44  ;;  %2082 = vmatprep.mubr.msk.bf16.mxu1 %vm2594_vm0, %v2593_v0 }
 0x3d1   : > { %2092 = vmatprep.subr.bf16.mxu1 %v2593_v0  ;;  %v1183_v49 = vadd.f32 %v1086_v42, %v1021_v47  ;;  %v1024_v50 = vpack.c.bf16 %v1021_v47, %v1021_v47 }
 0x3d2   : > { %v2298_v46 = vpop.eup %2297 }
 0x3d3   : > { %v1244_v48 = vmul.f32 %v2298_v46, %v2290_v33  ;;  %v2284_v33 = vld [vmem:[%s3190_s15 + $0x38] sm:$0xff]  }
 0x3d5   : > { %v1295_v52 = vadd.f32 %v1244_v48, %v1183_v49  ;;  %v1247_v56 = vpack.c.bf16 %v1244_v48, %v1244_v48 }
 0x3da   : > { %v2300_v51 = vpop.eup %2299 }
 0x3db   : > { %v1356_v53 = vmul.f32 %v2300_v51, %v2292_v35  ;;  %2083 = vmatmul.mubr.msk.bf16.vlgmr.msra.gmra.mrb[4].mxu1 %vm1010_vm13, %v1024_v50 }
 0x3dc   : > { %2093 = vmatpush3.bf16.msra.mxu1 %v2989_v57  ;;  %2094 = vmatprep.mubr.msk.bf16.mxu1 %vm2594_vm0, %v2593_v0 }
 0x3dd   : > { %v1407_v54 = vadd.f32 %v1356_v53, %v1295_v52  ;;  %2104 = vmatprep.subr.bf16.mxu1 %v2593_v0  ;;  %v1359_v57 = vpack.c.bf16 %v1356_v53, %v1356_v53 }
 0x3df   : > { %v1717_v55 = vmul.f32 0.25, %v1407_v54 }
 0x3e1   : > { %1718 = vst.msk [vmem:[%s3022_s24] sm:$0xff] %vm1010_vm13, %v1717_v55 }
 0x3e7   : > { %2095 = vmatmul.mubr.msk.bf16.vlgmr.msra.gmra.mrb[4].mxu1 %vm1010_vm13, %v1247_v56 }
 0x3e8   : > { %2105 = vmatpush3.bf16.msra.mxu1 %v2991_v58  ;;  %2106 = vmatprep.mubr.msk.bf16.mxu1 %vm2594_vm0, %v2593_v0 }
 0x3e9   : > { %2126 = vmatprep.subr.bf16.mxu1 %v2593_v0 }
 0x3f3   : > { %2107 = vmatmul.mubr.msk.bf16.vlgmr.msra.gmra.mrb[4].mxu1 %vm1010_vm13, %v1359_v57 }
 0x3f4   : > { %2142 = vmatprep.mubr.msk.bf16.mxu1 %vm2594_vm0, %v2593_v0 }
 0x4c6   : > { %v1400_v60 = vpop.f32.mrb[4].mxu1 }
 0x4c7   : > { %v1408_v58 = vpack.c.bf16 %v1400_v60, %v1400_v60  ;;  %v2108_v61 = vpop.f32.mrb[5].mxu1 }
 0x4c8   : > { %v1403_v62 = vpop.f32.mrb[6].mxu1 }
 0x4c9   : > { %v2109_v63 = vpop.f32.mrb[7].mxu1  ;;  %2115 = vmatmul.mubr.msk.bf16.vlgmr.msra.gmra.mrb[24].mxu0 %vm776_vm1, %v1408_v58 }
 0x4ca   : > { %2122 = vmatprep.mubr.msk.bf16.mxu0 %vm2594_vm0, %v2593_v0  ;;  %2119 = vmatpush3.bf16.msra.mxu0 %v2275_v15 }
 0x4cb   : > { %2120 = vmatprep.subr.bf16.mxu0 %v2593_v0 }
 0x4ce   : > { %2121 = vmatpush3.bf16.msra.mxu0 %v2276_v16 }
 0x59c   : > { %v1469_v2 = vpop.f32.mrb[24].mxu0 }
 0x59d   : > { %v1470_v4 = vadd.f32 %v1971_v1, %v1469_v2  ;;  %v2116_v5 = vpop.f32.mrb[25].mxu0 }
 0x59e   : > { %v1472_v6 = vpop.f32.mrb[26].mxu0 }
 0x59f   : > { %v2117_v7 = vpop.f32.mrb[27].mxu0  ;;  %v1475_v8 = vadd.f32 %v1470_v4, %v2930_v3  ;;  %v2277_v3 = vld [vmem:[%s3190_s15] sm:$0xff]  }
 0x5a0   : > { %2127 = vmatpush3.bf16.msra.mxu1 %v2277_v3 }
 0x5a1   : > { %v1476_v9 = vsel %vm776_vm1, %v1475_v8, 0.0  ;;  %2128 = vmatprep.subr.bf16.mxu1 %v2593_v0 }
 0x5a2   : > { %1477 = vadd.xlane.f32.xlu0 %v1476_v9 }
 0x5a4   : > { %2129 = vmatpush3.bf16.msra.mxu1 %v2278_v17 }
 0x5a5   : > { %2130 = vmatprep.subr.bf16.mxu1 %v2593_v0 }
 0x5a8   : > { %2131 = vmatpush3.bf16.msra.mxu1 %v2279_v18 }
 0x5a9   : > { %2132 = vmatprep.subr.bf16.mxu1 %v2593_v0 }
 0x5ac   : > { %2133 = vmatpush3.bf16.msra.mxu1 %v2280_v19 }
 0x5ad   : > { %2134 = vmatprep.subr.bf16.mxu1 %v2593_v0 }
 0x5b0   : > { %2135 = vmatpush3.bf16.msra.mxu1 %v2281_v20 }
 0x5b1   : > { %2136 = vmatprep.subr.bf16.mxu1 %v2593_v0 }
 0x5b4   : > { %2137 = vmatpush3.bf16.msra.mxu1 %v2282_v21 }
 0x5b5   : > { %2138 = vmatprep.subr.bf16.mxu1 %v2593_v0 }
 0x5b8   : > { %2139 = vmatpush3.bf16.msra.mxu1 %v2283_v32 }
 0x5b9   : > { %2140 = vmatprep.subr.bf16.mxu1 %v2593_v0  ;;  %v1981_v0 = vld [vmem:[%s3191_s16] ss:$0 sm:$0xff] }
 0x5bc   : > { %2141 = vmatpush3.bf16.msra.mxu1 %v2284_v33 }
 0x62f   : > { %v1478_v10 = vpop.xlane.xlu0 %1477 }
 0x630   : > { %v1480_v11 = vmul.f32 0.03125, %v1478_v10 }
 0x632   : > { %v1481_v12 = vsub.f32 %v1475_v8, %v1480_v11 }
 0x634   : > { %v1482_v13 = vmul.f32 %v1481_v12, %v1481_v12 }
 0x636   : > { %v1483_v14 = vsel %vm776_vm1, %v1482_v13, 0.0 }
 0x637   : > { %1484 = vadd.xlane.f32.xlu1 %v1483_v14 }
 0x6c4   : > { %v1485_v22 = vpop.xlane.xlu1 %1484 }
 0x6c5   : > { %v1486_v23 = vmul.f32 0.03125, %v1485_v22 }
 0x6c7   : > { %v1487_v24 = vadd.f32 1e-05, %v1486_v23 }
 0x6c9   : > { %2301 = vrsqrt.f32 %v1487_v24 }
 0x6d3   : > { %v2302_v25 = vpop.eup %2301 }
 0x6d4   : > { %v1489_v27 = vmul.f32 %v2302_v25, %v1481_v12 }
 0x6d6   : > { %v1497_v29 = vmul.f32 %v1975_v26, %v1489_v27 }
 0x6d8   : > { %v1505_v30 = vadd.f32 %v1976_v28, %v1497_v29 }
 0x6da   : > { %v1506_v31 = vpack.c.bf16 %v1505_v30, %v1505_v30 }
 0x6dc   : > { %2123 = vmatmul.mubr.msk.bf16.vlgmr.msra.gmra.mrb[28].mxu0 %vm776_vm1, %v1506_v31 }
 0x7af   : > { %v1567_v35 = vpop.f32.mrb[28].mxu0 }
 0x7b0   : > { %v1568_v36 = vadd.f32 %v1977_v34, %v1567_v35  ;;  %v2124_v37 = vpop.f32.mrb[29].mxu0 }
 0x7b1   : > { %v1570_v38 = vpop.f32.mrb[30].mxu0 }
 0x7b2   : > { %v1573_v39 = vmax.f32 %v1568_v36, 0.0  ;;  %v2125_v40 = vpop.f32.mrb[31].mxu0 }
 0x7b4   : > { %v1574_v41 = vpack.c.bf16 %v1573_v39, %v1573_v39 }
 0x7b6   : > { %2143 = vmatmul.mubr.bf16.vlgmr.msra.gmra.mrb[8].mxu1 %v1574_v41 }
 0x889   : > { %v1680_v42 = vpop.f32.mrb[8].mxu1 }
 0x88a   : > { %v1681_v43 = vadd.f32 %v1981_v0, %v1680_v42  ;;  %v2144_v44 = vpop.f32.mrb[9].mxu1 }
 0x88b   : > { %v1683_v45 = vpop.f32.mrb[10].mxu1 }
 0x88c   : > { %v2145_v46 = vpop.f32.mrb[11].mxu1  ;;  %v1686_v47 = vadd.f32 %v1681_v43, %v1505_v30 }
 0x88e   : > { %v1687_v48 = vsel %vm776_vm1, %v1686_v47, 0.0 }
 0x88f   : > { %1688 = vadd.xlane.f32.xlu0 %v1687_v48 }
 0x91c   : > { %v1689_v49 = vpop.xlane.xlu0 %1688 }
 0x91d   : > { %v1690_v50 = vmul.f32 0.03125, %v1689_v49 }
 0x91f   : > { %v1691_v51 = vsub.f32 %v1686_v47, %v1690_v50 }
 0x921   : > { %v1692_v52 = vmul.f32 %v1691_v51, %v1691_v51 }
 0x923   : > { %v1693_v53 = vsel %vm776_vm1, %v1692_v52, 0.0 }
 0x924   : > { %1694 = vadd.xlane.f32.xlu1 %v1693_v53 }
 0x925   : > { %2486 = shalt.err (!%p2483_p6)
}
 0x926   : > { %s2487_s24 = scalar_lea.hbm %s3097_s1, 128  ;;  %s2491_s3 = scalar_lea.hbm %s3252_s28, 256 }
 0x927   : > { %p2488_p5 = scmp.ne.s32.totalorder %s3097_s1, %s2487_s24  ;;  %p2492_p10 = scmp.lt.u32.totalorder %s3097_s1, %s3252_s28 }
 0x928   : > { %p2493_p2 = scmp.lt.u32.totalorder %s2491_s3, %s2487_s24  ;;  %p2495_p4 = scmp.lt.u32.totalorder %s2487_s24, %s3097_s1 }
 0x929   : > { %p2489_p9 = pnand %p2488_p5, %p3253_p7 }
 0x92a   : > { %p2494_p3 = por %p2493_p2, %p2492_p10 }
 0x92b   : > { %p2490_p12 = pneg %p2489_p9 }
 0x92c   : > { %p2496_p8 = por %p2495_p4, %p2494_p3 }
 0x92e   : > { %p2497_p11 = pnand %p2496_p8, %p2490_p12 }
 0x930   : > { %2500 = shalt.err (!%p2497_p11)
}
 0x931   : > { %2183 = dma.vmem_to_hbm [thread:$0]  (%p3253_p7), %s1752_s30, 128, %s3097_s1, %s1725_s25  }
 0x932   : > { %s3254_s23 = sld [smem:[#allocation36_spill]]  ;;  %s3255_s27 = sld [smem:[#allocation37_spill]] }
 0x933   : > { %s728_s3 = scalar_lea.vmem [#allocation13], %s1942_s18  ;;  %s3256_s25 = sld [smem:[#allocation38_spill]] }
 0x934   : > { %s1738_s19 = sshll.u32 %s728_s3, 4  ;;  %s1720_s0 = scalar_lea.sflag [#allocation4], %s3012_s4  ;;  %s3133_s19 = int_to_ptr.vmem [resolvable:$true] %s1738_s19 }
 0x935   : > { %s2501_s26 = scalar_lea.vmem %s3133_s19, 128  ;;  %s2596_s18 = smov [#allocation13]  }
 0x936   : > { %p2502_p13 = scmp.ne.s32.totalorder %s3133_s19, %s2501_s26  ;;  %s2505_s2 = sshll.u32 %s2596_s18, 4  ;;  %s2506_s2 = int_to_ptr.vmem [resolvable:$false] %s2505_s2 }
 0x937   : > { %p2508_p6 = scmp.lt.s32.totalorder %s3133_s19, %s2506_s2 }
 0x938   : > { %v1990_v59 = vld [vmem:[%s3254_s23] ss:$0 sm:$0xff]  ;;  %p2503_p1 = pnand %p2502_p13, %p3253_p7  ;;  %s2507_s23 = scalar_lea.vmem %s2506_s2, 256 }
 0x939   : > { %v1991_v58 = vld [vmem:[%s3255_s27] ss:$0 sm:$0xff]  ;;  %s3131_s21 = scalar_lea.hbm %s3256_s25, %s1994_s20  ;;  %p2509_p5 = scmp.lt.s32.totalorder %s2507_s23, %s2501_s26 }
 0x93a   : > { %p2504_p0 = pneg %p2503_p1 }
 0x93b   : > { %p2510_p9 = por %p2509_p5, %p2508_p6 }
 0x93d   : > { %p2511_p12 = pnand %p2510_p9, %p2504_p0 }
 0x9b1   : > { %v1695_v54 = vpop.xlane.xlu1 %1694 }
 0x9b2   : > { %v1696_v55 = vmul.f32 0.03125, %v1695_v54 }
 0x9b4   : > { %v1697_v56 = vadd.f32 1e-05, %v1696_v55 }
 0x9b6   : > { %2303 = vrsqrt.f32 %v1697_v56 }
 0x9c0   : > { %v2304_v57 = vpop.eup %2303 }
 0x9c1   : > { %v1699_v60 = vmul.f32 %v2304_v57, %v1691_v51 }
 0x9c3   : > { %v1707_v61 = vmul.f32 %v1990_v59, %v1699_v60 }
 0x9c5   : > { %v1715_v62 = vadd.f32 %v1991_v58, %v1707_v61 }
 0x9c7   : > { %1716 = vst.msk [vmem:[%s728_s3] sm:$0xff] %vm776_vm1, %v1715_v62 }
 0x9c8   : > { %2514 = shalt.err (!%p2511_p12)
}
 0x9c9   : > { %s2515_s4 = scalar_lea.hbm %s3131_s21, 128  ;;  %s2519_s17 = scalar_lea.hbm %s3256_s25, 256 }
 0x9ca   : > { %p2516_p10 = scmp.ne.s32.totalorder %s3131_s21, %s2515_s4  ;;  %p2520_p4 = scmp.lt.u32.totalorder %s3131_s21, %s3256_s25 }
 0x9cb   : > { %p2521_p8 = scmp.lt.u32.totalorder %s2519_s17, %s2515_s4  ;;  %p2523_p13 = scmp.lt.u32.totalorder %s2515_s4, %s3131_s21 }
 0x9cc   : > { %p2517_p2 = pnand %p2516_p10, %p3253_p7 }
 0x9cd   : > { %p2522_p11 = por %p2521_p8, %p2520_p4 }
 0x9ce   : > { %p2518_p3 = pneg %p2517_p2 }
 0x9cf   : > { %p2524_p1 = por %p2523_p13, %p2522_p11 }
 0x9d1   : > { %p2525_p0 = pnand %p2524_p1, %p2518_p3 }
 0x9d3   : > { %2528 = shalt.err (!%p2525_p0)
}
 0x9d4   : > { %2182 = dma.vmem_to_hbm [thread:$0]  (%p3253_p7), %s3133_s19, 128, %s3131_s21, %s1720_s0  }
 0x9d5 PF: > { %s3257_s1 = sld [smem:[#allocation24_spill]]  ;;  %s3258_s30 = sld [smem:[#allocation22_spill]] }
 0x9d6   : > { %s3259_s26 = sld [smem:[#allocation28_spill]] }
 0x9db   : > { %p2224_p6 = scmp.ge.s32.totalorder %s3257_s1, 2  ;;  %s1763_s18 = sand.u32 1, %s3258_s30  }
 0x9dc   : > { %p3260_p5 = scmp.ne.s32.totalorder %s3259_s26, 0  ;;  %s1764_s2 = scalar_lea.sflag [#allocation4], %s1763_s18 }
 0x9de   : > { %p2206_p9 = pnand %p2224_p6, %p3260_p5 }
 0x9e0   : > { %2562 = dma.done.wait (!%p2206_p9), %s1764_s2, 128  }
 0x9e1   : > { %2564 = vsyncadd (!%p2206_p9), %s1764_s2, 4294967168  ;;  %s1773_s23 = scalar_lea.sflag [#allocation15], %s1763_s18 }
 0x9e2   : > { %2566 = dma.done.wait (!%p2206_p9), %s1773_s23, 128  }
 0x9e3   : > { %2568 = vsyncadd (!%p2206_p9), %s1773_s23, 4294967168  ;;  %s3261_s24 = sld [smem:[#allocation25_spill]]  ;;  %s3262_s10 = sld [smem:[#allocation23_spill]] }
 0x9e4   : > { %s3263_s23 = sld [smem:[#allocation26_spill]]  ;;  %s3264_s1 = smov %s2575_s22 }
 0x9e9   : > { %p38_p7 = scmp.ge.s32.totalorder %s3261_s24, 4   ;;  %s3265_s22 = smov %s3262_s10 }
 0x9eb   :  { %40 = sbr.rel (!%p38_p7) target bundleno = 21 (0x15), region = 179 }
 0x9f2   :  { %1778 = vsyncpa [#allocation3], 1 }
 0x9f3   :  { %1780 = vsyncpa [#allocation3 + $0x1], 1 }
 0x9f4   :  { %1781 = vsyncpa [#allocation6], 1 }
 0x9f5   :  { %1782 = vsyncpa [#allocation9], 1 }
 0x9f6   :  { %1783 = vsyncpa [#allocation12], 1 }
 0x9f7   :  { %1784 = vsyncpa [#allocation4], 1 }
 0x9f8   :  { %1786 = vsyncpa [#allocation4 + $0x1], 1 }
 0x9f9   :  { %1787 = vsyncpa [#allocation15], 1 }
 0x9fa   :  { %1789 = vsyncpa [#allocation15 + $0x1], 1 }

</bundles_post_ra>
